<compile_context>
chip_gen: v7x
topology: tpu7x:2x2x1
jax: 0.10.0
libtpu: 0.0.40
codegen_flags: <defaults>
</compile_context>

<pallas_src>
import jax
import jax.numpy as jnp
from jax import lax
from jax.experimental import pallas as pl
from jax.experimental.pallas import tpu as pltpu


def _round_up(x, m):
    return (x + m - 1) // m * m


def _vmem_limit_bytes(default=48 * 1024 * 1024):
    # Generation-aware scoped-VMEM limit: ~96 MiB on v5e/v6e (128 MiB phys),
    # ~48 MiB on v7x (64 MiB phys).
    try:
        cap = int(pltpu.get_tpu_info().vmem_capacity_bytes)
        return min(cap * 3 // 4, 100 * 1024 * 1024)
    except Exception:
        return default


# ------------------------------- Wrapper ------------------------------------

def conv_norm_act(x, conv_w, gamma, beta, *, eps=1e-5):
    """
    x      : [N, C, H, W]  float32
    conv_w : [OC, C, K, K] float32 (PyTorch Conv2d weight layout)
    gamma  : [OC], beta : [OC]
    returns: [N, OC, OH, OW]   (kernel=3, stride=1, padding=0, no bias,
             BatchNorm2d training-mode batch stats, ReLU)
    """
    n, c, h, w = x.shape
    oc, _, k, _ = conv_w.shape
    oh, ow = h - k + 1, w - k + 1

    cp = _round_up(c, 8)                      # sublane-aligned channels
    ocp = _round_up(oc, 128)                  # lane/sublane-dense out channels
    s = _round_up(oh * w, 128)                # lane-dense conv columns / image
    xflat = _round_up((k - 1) * w + (k - 1) + s, 128)

    # Flat channel-major image slab (no transpose of x, no im2col).  The zero
    # padding only feeds garbage columns that are masked out of the statistics
    # and sliced off the output.
    x_flat = jnp.zeros((n, cp, xflat), jnp.float32)
    x_flat = x_flat.at[:, :c, : h * w].set(x.reshape(n, c, h * w).astype(jnp.float32))

    # Weights as [K*K, OCP, CP]: tap-major, matching the per-tap slices below.
    w_r = jnp.transpose(conv_w.astype(jnp.float32), (2, 3, 0, 1)).reshape(k * k, oc, c)
    w_p = jnp.zeros((k * k, ocp, cp), jnp.float32).at[:, :oc, :c].set(w_r)

    # Column validity mask (column q = oh_idx*W + ow_idx is valid iff it is a
    # real output position).  Built once in JAX; tiny.
    qidx = jnp.arange(s, dtype=jnp.int32)
    col_mask = (((qidx < oh * w) & ((qidx % w) < ow))
                .astype(jnp.float32).reshape(1, s))

    def conv_tile(x_ref, w_ref):
        """In-kernel im2col + matmul for one image: returns [OCP, S] f32."""
        x_img = x_ref[0]                                          # [CP, XFLAT]
        acc = None
        for ki in range(k):
            for kj in range(k):
                off = ki * w + kj
                slab = x_img[:, off:off + s]                      # [CP, S]
                part = jnp.dot(w_ref[ki * k + kj], slab,          # MXU
                               preferred_element_type=jnp.float32)
                acc = part if acc is None else acc + part
        return acc                                                # [OCP, S]

    # ---- Pass 1: per-image conv -> per-image sum / sum-of-squares partials ----
    def stats_kernel(x_ref, w_ref, mask_ref, sum_ref, ssq_ref):
        conv_t = conv_tile(x_ref, w_ref)
        cm = conv_t * mask_ref[...]                # zero out invalid columns
        sum_ref[0] = jnp.sum(cm, axis=1, keepdims=True)           # [OCP, 1]
        ssq_ref[0] = jnp.sum(cm * cm, axis=1, keepdims=True)

    # ---- Pass 2: recompute conv fused with folded BN scale/shift + ReLU -------
    def bn_relu_kernel(x_ref, w_ref, scale_ref, shift_ref, out_ref):
        conv_t = conv_tile(x_ref, w_ref)
        out_ref[0] = jnp.maximum(conv_t * scale_ref[...] + shift_ref[...], 0.0)

    vmem_limit = _vmem_limit_bytes()
    conv_flops = 2 * n * (k * k * cp) * ocp * s
    x_bytes = 4 * n * cp * xflat
    w_bytes = 4 * k * k * ocp * cp

    psum, pssq = pl.pallas_call(
        stats_kernel,
        out_shape=(
            jax.ShapeDtypeStruct((n, ocp, 1), jnp.float32),
            jax.ShapeDtypeStruct((n, ocp, 1), jnp.float32),
        ),
        grid=(n,),
        in_specs=[
            pl.BlockSpec((1, cp, xflat), lambda i: (i, 0, 0)),    # one image
            pl.BlockSpec((k * k, ocp, cp), lambda i: (0, 0, 0)),  # resident W
            pl.BlockSpec((1, s), lambda i: (0, 0)),               # column mask
        ],
        out_specs=(
            pl.BlockSpec((1, ocp, 1), lambda i: (i, 0, 0)),
            pl.BlockSpec((1, ocp, 1), lambda i: (i, 0, 0)),
        ),
        compiler_params=pltpu.CompilerParams(
            dimension_semantics=("parallel",),
            vmem_limit_bytes=vmem_limit),
        cost_estimate=pl.CostEstimate(
            flops=conv_flops, transcendentals=0,
            bytes_accessed=x_bytes + w_bytes + 4 * s + 8 * n * ocp),
    )(x_flat, w_p, col_mask)

    # Fold BN (training-mode batch stats) into one per-channel scale/shift.
    # Per-image partials are reduced here, outside the kernel; E[y^2]-E[y]^2 in
    # f32 is adequate at these sizes (a shifted two-pass variance would be
    # safer at very large N*OH*OW).
    count = float(n * oh * ow)
    mean = jnp.sum(psum[:, :, 0], axis=0) / count                 # [OCP]
    var = jnp.sum(pssq[:, :, 0], axis=0) / count - mean * mean    # biased (BN)
    gamma_p = jnp.zeros((ocp,), jnp.float32).at[:oc].set(gamma.astype(jnp.float32))
    beta_p = jnp.zeros((ocp,), jnp.float32).at[:oc].set(beta.astype(jnp.float32))
    inv_std = lax.rsqrt(var + eps)
    scale = (gamma_p * inv_std).reshape(ocp, 1)
    shift = (beta_p - mean * gamma_p * inv_std).reshape(ocp, 1)

    out_p = pl.pallas_call(
        bn_relu_kernel,
        out_shape=jax.ShapeDtypeStruct((n, ocp, s), jnp.float32),
        grid=(n,),
        in_specs=[
            pl.BlockSpec((1, cp, xflat), lambda i: (i, 0, 0)),
            pl.BlockSpec((k * k, ocp, cp), lambda i: (0, 0, 0)),
            pl.BlockSpec((ocp, 1), lambda i: (0, 0)),
            pl.BlockSpec((ocp, 1), lambda i: (0, 0)),
        ],
        out_specs=pl.BlockSpec((1, ocp, s), lambda i: (i, 0, 0)),
        compiler_params=pltpu.CompilerParams(
            dimension_semantics=("parallel",),
            vmem_limit_bytes=vmem_limit),
        cost_estimate=pl.CostEstimate(
            flops=conv_flops, transcendentals=0,
            bytes_accessed=x_bytes + w_bytes + 8 * ocp + 4 * n * ocp * s),
    )(x_flat, w_p, scale, shift)

    # Channel-major output -> strip channel/lane padding and the invalid
    # right-edge columns.  No transpose needed for NCHW.
    out = out_p[:, :oc, : oh * w].reshape(n, oc, oh, w)[:, :, :, :ow]
    return out


# ------------------------------ Reference -----------------------------------

def reference(x, conv_w, gamma, beta):
    y = lax.conv_general_dilated(
        x, conv_w, window_strides=(1, 1), padding="VALID",
        dimension_numbers=("NCHW", "OIHW", "NCHW"))
    mean = jnp.mean(y, axis=(0, 2, 3), keepdims=True)
    var = jnp.var(y, axis=(0, 2, 3), keepdims=True)               # biased
    yn = (y - mean) / jnp.sqrt(var + 1e-5)
    yn = yn * gamma.reshape(1, -1, 1, 1) + beta.reshape(1, -1, 1, 1)
    return jnp.maximum(yn, 0.0)


# -------------------------------- Main ---------------------------------------

if __name__ == "__main__":
    key = jax.random.PRNGKey(0)
    k_x, k_w, k_g, k_b = jax.random.split(key, 4)

    N, C, H, W = 2, 4, 16, 16
    OC, K = 8, 3

    x = jax.random.normal(k_x, (N, C, H, W), dtype=jnp.float32)
    conv_w = jax.random.normal(k_w, (OC, C, K, K), dtype=jnp.float32) * 0.1
    gamma = 1.0 + 0.1 * jax.random.normal(k_g, (OC,), dtype=jnp.float32)
    beta = 0.1 * jax.random.normal(k_b, (OC,), dtype=jnp.float32)

    out = conv_norm_act(x, conv_w, gamma, beta)
    out = jax.block_until_ready(out)

    ref = reference(x, conv_w, gamma, beta)
    assert out.shape == (N, OC, H - K + 1, W - K + 1)
    assert jnp.allclose(out, ref, atol=1e-4, rtol=1e-4), "mismatch vs reference"

    print("KERNEL_OK")
</pallas_src>

<mosaic_0001>
module attributes {stable_mosaic.version = 11 : i64} {
  func.func @stats_kernel(%arg0: i32, %arg1: memref<1x8x384xf32, #tpu.memory_space<vmem>>, %arg2: memref<9x128x8xf32, #tpu.memory_space<vmem>>, %arg3: memref<1x256xf32, #tpu.memory_space<vmem>>, %arg4: memref<1x128x1xf32, #tpu.memory_space<vmem>>, %arg5: memref<1x128x1xf32, #tpu.memory_space<vmem>>) attributes {dimension_semantics = [#tpu.dimension_semantics<parallel>], iteration_bounds = array<i64: 2>, scalar_prefetch = 0 : i64, scratch_operands = 0 : i64, tpu.core_type = #tpu.core_type<tc>, window_params = [{transform_indices = @transform_0, window_bounds = array<i64: 1, 8, 384>}, {pipeline_mode = #tpu.pipeline_mode<synchronous>, transform_indices = @transform_1, window_bounds = array<i64: 9, 128, 8>}, {pipeline_mode = #tpu.pipeline_mode<synchronous>, transform_indices = @transform_2, window_bounds = array<i64: 1, 256>}, {transform_indices = @transform_3, window_bounds = array<i64: 1, 128, 1>}, {transform_indices = @transform_4, window_bounds = array<i64: 1, 128, 1>}]} {
    %c0 = arith.constant 0 : index
    %c0_0 = arith.constant 0 : index
    %c0_1 = arith.constant 0 : index
    %0 = vector.load %arg1[%c0, %c0_0, %c0_1] : memref<1x8x384xf32, #tpu.memory_space<vmem>>, vector<1x8x384xf32>
    %1 = vector.shape_cast %0 : vector<1x8x384xf32> to vector<8x384xf32>
    %2 = vector.extract_strided_slice %1 {offsets = [0, 0], sizes = [8, 256], strides = [1, 1]} : vector<8x384xf32> to vector<8x256xf32>
    %c0_2 = arith.constant 0 : index
    %c0_3 = arith.constant 0 : index
    %c0_4 = arith.constant 0 : index
    %3 = vector.load %arg2[%c0_2, %c0_3, %c0_4] : memref<9x128x8xf32, #tpu.memory_space<vmem>>, vector<1x128x8xf32>
    %4 = vector.shape_cast %3 : vector<1x128x8xf32> to vector<128x8xf32>
    %cst = arith.constant dense<0.000000e+00> : vector<128x256xf32>
    %5 = tpu.matmul %4, %2, %cst {dimension_numbers = #tpu.dot_dimension_numbers<[1], [0], [0], [1], [0, 0, 1, 1], [], []>} : vector<128x8xf32>, vector<8x256xf32>, vector<128x256xf32> -> vector<128x256xf32>
    %6 = vector.extract_strided_slice %1 {offsets = [0, 1], sizes = [8, 256], strides = [1, 1]} : vector<8x384xf32> to vector<8x256xf32>
    %c1 = arith.constant 1 : index
    %c0_5 = arith.constant 0 : index
    %c0_6 = arith.constant 0 : index
    %7 = vector.load %arg2[%c1, %c0_5, %c0_6] : memref<9x128x8xf32, #tpu.memory_space<vmem>>, vector<1x128x8xf32>
    %8 = vector.shape_cast %7 : vector<1x128x8xf32> to vector<128x8xf32>
    %cst_7 = arith.constant dense<0.000000e+00> : vector<128x256xf32>
    %9 = tpu.matmul %8, %6, %cst_7 {dimension_numbers = #tpu.dot_dimension_numbers<[1], [0], [0], [1], [0, 0, 1, 1], [], []>} : vector<128x8xf32>, vector<8x256xf32>, vector<128x256xf32> -> vector<128x256xf32>
    %10 = arith.addf %5, %9 : vector<128x256xf32>
    %11 = vector.extract_strided_slice %1 {offsets = [0, 2], sizes = [8, 256], strides = [1, 1]} : vector<8x384xf32> to vector<8x256xf32>
    %c2 = arith.constant 2 : index
    %c0_8 = arith.constant 0 : index
    %c0_9 = arith.constant 0 : index
    %12 = vector.load %arg2[%c2, %c0_8, %c0_9] : memref<9x128x8xf32, #tpu.memory_space<vmem>>, vector<1x128x8xf32>
    %13 = vector.shape_cast %12 : vector<1x128x8xf32> to vector<128x8xf32>
    %cst_10 = arith.constant dense<0.000000e+00> : vector<128x256xf32>
    %14 = tpu.matmul %13, %11, %cst_10 {dimension_numbers = #tpu.dot_dimension_numbers<[1], [0], [0], [1], [0, 0, 1, 1], [], []>} : vector<128x8xf32>, vector<8x256xf32>, vector<128x256xf32> -> vector<128x256xf32>
    %15 = arith.addf %10, %14 : vector<128x256xf32>
    %16 = vector.extract_strided_slice %1 {offsets = [0, 16], sizes = [8, 256], strides = [1, 1]} : vector<8x384xf32> to vector<8x256xf32>
    %c3 = arith.constant 3 : index
    %c0_11 = arith.constant 0 : index
    %c0_12 = arith.constant 0 : index
    %17 = vector.load %arg2[%c3, %c0_11, %c0_12] : memref<9x128x8xf32, #tpu.memory_space<vmem>>, vector<1x128x8xf32>
    %18 = vector.shape_cast %17 : vector<1x128x8xf32> to vector<128x8xf32>
    %cst_13 = arith.constant dense<0.000000e+00> : vector<128x256xf32>
    %19 = tpu.matmul %18, %16, %cst_13 {dimension_numbers = #tpu.dot_dimension_numbers<[1], [0], [0], [1], [0, 0, 1, 1], [], []>} : vector<128x8xf32>, vector<8x256xf32>, vector<128x256xf32> -> vector<128x256xf32>
    %20 = arith.addf %15, %19 : vector<128x256xf32>
    %21 = vector.extract_strided_slice %1 {offsets = [0, 17], sizes = [8, 256], strides = [1, 1]} : vector<8x384xf32> to vector<8x256xf32>
    %c4 = arith.constant 4 : index
    %c0_14 = arith.constant 0 : index
    %c0_15 = arith.constant 0 : index
    %22 = vector.load %arg2[%c4, %c0_14, %c0_15] : memref<9x128x8xf32, #tpu.memory_space<vmem>>, vector<1x128x8xf32>
    %23 = vector.shape_cast %22 : vector<1x128x8xf32> to vector<128x8xf32>
    %cst_16 = arith.constant dense<0.000000e+00> : vector<128x256xf32>
    %24 = tpu.matmul %23, %21, %cst_16 {dimension_numbers = #tpu.dot_dimension_numbers<[1], [0], [0], [1], [0, 0, 1, 1], [], []>} : vector<128x8xf32>, vector<8x256xf32>, vector<128x256xf32> -> vector<128x256xf32>
    %25 = arith.addf %20, %24 : vector<128x256xf32>
    %26 = vector.extract_strided_slice %1 {offsets = [0, 18], sizes = [8, 256], strides = [1, 1]} : vector<8x384xf32> to vector<8x256xf32>
    %c5 = arith.constant 5 : index
    %c0_17 = arith.constant 0 : index
    %c0_18 = arith.constant 0 : index
    %27 = vector.load %arg2[%c5, %c0_17, %c0_18] : memref<9x128x8xf32, #tpu.memory_space<vmem>>, vector<1x128x8xf32>
    %28 = vector.shape_cast %27 : vector<1x128x8xf32> to vector<128x8xf32>
    %cst_19 = arith.constant dense<0.000000e+00> : vector<128x256xf32>
    %29 = tpu.matmul %28, %26, %cst_19 {dimension_numbers = #tpu.dot_dimension_numbers<[1], [0], [0], [1], [0, 0, 1, 1], [], []>} : vector<128x8xf32>, vector<8x256xf32>, vector<128x256xf32> -> vector<128x256xf32>
    %30 = arith.addf %25, %29 : vector<128x256xf32>
    %31 = vector.extract_strided_slice %1 {offsets = [0, 32], sizes = [8, 256], strides = [1, 1]} : vector<8x384xf32> to vector<8x256xf32>
    %c6 = arith.constant 6 : index
    %c0_20 = arith.constant 0 : index
    %c0_21 = arith.constant 0 : index
    %32 = vector.load %arg2[%c6, %c0_20, %c0_21] : memref<9x128x8xf32, #tpu.memory_space<vmem>>, vector<1x128x8xf32>
    %33 = vector.shape_cast %32 : vector<1x128x8xf32> to vector<128x8xf32>
    %cst_22 = arith.constant dense<0.000000e+00> : vector<128x256xf32>
    %34 = tpu.matmul %33, %31, %cst_22 {dimension_numbers = #tpu.dot_dimension_numbers<[1], [0], [0], [1], [0, 0, 1, 1], [], []>} : vector<128x8xf32>, vector<8x256xf32>, vector<128x256xf32> -> vector<128x256xf32>
    %35 = arith.addf %30, %34 : vector<128x256xf32>
    %36 = vector.extract_strided_slice %1 {offsets = [0, 33], sizes = [8, 256], strides = [1, 1]} : vector<8x384xf32> to vector<8x256xf32>
    %c7 = arith.constant 7 : index
    %c0_23 = arith.constant 0 : index
    %c0_24 = arith.constant 0 : index
    %37 = vector.load %arg2[%c7, %c0_23, %c0_24] : memref<9x128x8xf32, #tpu.memory_space<vmem>>, vector<1x128x8xf32>
    %38 = vector.shape_cast %37 : vector<1x128x8xf32> to vector<128x8xf32>
    %cst_25 = arith.constant dense<0.000000e+00> : vector<128x256xf32>
    %39 = tpu.matmul %38, %36, %cst_25 {dimension_numbers = #tpu.dot_dimension_numbers<[1], [0], [0], [1], [0, 0, 1, 1], [], []>} : vector<128x8xf32>, vector<8x256xf32>, vector<128x256xf32> -> vector<128x256xf32>
    %40 = arith.addf %35, %39 : vector<128x256xf32>
    %41 = vector.extract_strided_slice %1 {offsets = [0, 34], sizes = [8, 256], strides = [1, 1]} : vector<8x384xf32> to vector<8x256xf32>
    %c8 = arith.constant 8 : index
    %c0_26 = arith.constant 0 : index
    %c0_27 = arith.constant 0 : index
    %42 = vector.load %arg2[%c8, %c0_26, %c0_27] : memref<9x128x8xf32, #tpu.memory_space<vmem>>, vector<1x128x8xf32>
    %43 = vector.shape_cast %42 : vector<1x128x8xf32> to vector<128x8xf32>
    %cst_28 = arith.constant dense<0.000000e+00> : vector<128x256xf32>
    %44 = tpu.matmul %43, %41, %cst_28 {dimension_numbers = #tpu.dot_dimension_numbers<[1], [0], [0], [1], [0, 0, 1, 1], [], []>} : vector<128x8xf32>, vector<8x256xf32>, vector<128x256xf32> -> vector<128x256xf32>
    %45 = arith.addf %40, %44 : vector<128x256xf32>
    %c0_29 = arith.constant 0 : index
    %c0_30 = arith.constant 0 : index
    %46 = vector.load %arg3[%c0_29, %c0_30] : memref<1x256xf32, #tpu.memory_space<vmem>>, vector<1x256xf32>
    %47 = vector.broadcast %46 : vector<1x256xf32> to vector<128x256xf32>
    %48 = arith.mulf %45, %47 : vector<128x256xf32>
    %cst_31 = arith.constant dense<0.000000e+00> : vector<128xf32>
    %49 = vector.multi_reduction <add>, %48, %cst_31 [1] : vector<128x256xf32> to vector<128xf32>
    %50 = vector.shape_cast %49 : vector<128xf32> to vector<128x1xf32>
    %c0_32 = arith.constant 0 : index
    %c0_33 = arith.constant 0 : index
    %c0_34 = arith.constant 0 : index
    %51 = vector.load %arg4[%c0_32, %c0_33, %c0_34] : memref<1x128x1xf32, #tpu.memory_space<vmem>>, vector<1x128x1xf32>
    %52 = vector.shape_cast %51 : vector<1x128x1xf32> to vector<128x1xf32>
    %53 = vector.shape_cast %50 : vector<128x1xf32> to vector<1x128x1xf32>
    tpu.vector_store %arg4[%c0_32, %c0_33, %c0_34], %53 {strides = array<i32>} : memref<1x128x1xf32, #tpu.memory_space<vmem>>, vector<1x128x1xf32>,
    %54 = arith.mulf %48, %48 : vector<128x256xf32>
    %cst_35 = arith.constant dense<0.000000e+00> : vector<128xf32>
    %55 = vector.multi_reduction <add>, %54, %cst_35 [1] : vector<128x256xf32> to vector<128xf32>
    %56 = vector.shape_cast %55 : vector<128xf32> to vector<128x1xf32>
    %c0_36 = arith.constant 0 : index
    %c0_37 = arith.constant 0 : index
    %c0_38 = arith.constant 0 : index
    %57 = vector.load %arg5[%c0_36, %c0_37, %c0_38] : memref<1x128x1xf32, #tpu.memory_space<vmem>>, vector<1x128x1xf32>
    %58 = vector.shape_cast %57 : vector<1x128x1xf32> to vector<128x1xf32>
    %59 = vector.shape_cast %56 : vector<128x1xf32> to vector<1x128x1xf32>
    tpu.vector_store %arg5[%c0_36, %c0_37, %c0_38], %59 {strides = array<i32>} : memref<1x128x1xf32, #tpu.memory_space<vmem>>, vector<1x128x1xf32>,
    return
  }
  func.func @transform_0(%arg0: i32) -> (i32, i32, i32) {
    %c0_i32 = arith.constant 0 : i32
    %c0_i32_0 = arith.constant 0 : i32
    %c0_i32_1 = arith.constant 0 : i32
    return %arg0, %c0_i32, %c0_i32_0 : i32, i32, i32
  }
  func.func @transform_1(%arg0: i32) -> (i32, i32, i32) {
    %c0_i32 = arith.constant 0 : i32
    %c0_i32_0 = arith.constant 0 : i32
    %c0_i32_1 = arith.constant 0 : i32
    %c0_i32_2 = arith.constant 0 : i32
    return %c0_i32, %c0_i32_0, %c0_i32_1 : i32, i32, i32
  }
  func.func @transform_2(%arg0: i32) -> (i32, i32) {
    %c0_i32 = arith.constant 0 : i32
    %c0_i32_0 = arith.constant 0 : i32
    %c0_i32_1 = arith.constant 0 : i32
    return %c0_i32, %c0_i32_0 : i32, i32
  }
  func.func @transform_3(%arg0: i32) -> (i32, i32, i32) {
    %c0_i32 = arith.constant 0 : i32
    %c0_i32_0 = arith.constant 0 : i32
    %c0_i32_1 = arith.constant 0 : i32
    return %arg0, %c0_i32, %c0_i32_0 : i32, i32, i32
  }
  func.func @transform_4(%arg0: i32) -> (i32, i32, i32) {
    %c0_i32 = arith.constant 0 : i32
    %c0_i32_0 = arith.constant 0 : i32
    %c0_i32_1 = arith.constant 0 : i32
    return %arg0, %c0_i32, %c0_i32_0 : i32, i32, i32
  }
}

</mosaic_0001>

<bundles_post_ra>
// kernel: tpu_custom_call.1
= control target key start
LH: loop header
LB: loop body
LE: loop exit
PB: predicated region body
PF: predicated region fallthrough
CT: control target
= control target key end

     0   :  { %s3460_s15 = smov 0   ;;  %s4385_s0 = inlined_call_operand.vmem [shape: f32[2,8,384], index: 0, kind: input, shape index: {}]   ;;  %s4386_s1 = inlined_call_operand.vmem [shape: f32[9,128,8], index: 1, kind: input, shape index: {}]   ;;  %s4387_s2 = inlined_call_operand.vmem [shape: f32[1,256], index: 2, kind: input, shape index: {}]   ;;  %s4388_s3 = inlined_call_operand.vmem [shape: f32[2,128,1], index: 3, kind: output, shape index: {0}]   ;;  %s4389_s4 = inlined_call_operand.vmem [shape: f32[2,128,1], index: 4, kind: output, shape index: {1}]  }
   0x1 LB: > { %s2856_s16 = sadd.s32 4294967295, %s3424_s15   ;;  %p2860_p0 = scmp.ge.s32.totalorder %s3424_s15, 1  ;;  %s3424_s15 = sphi %s3460_s15, %s15_s15  }
   0x2   : > { %p165_p1 = scmp.lt.s32.totalorder %s3424_s15, 3 }
   0x4   : > { %p166_p2 = pnand %p2860_p0, %p165_p1 }
   0x5   : > { %p196_p3 = scmp.lt.s32.totalorder (!%p166_p2), %s2856_s16, 1  ;;  %v3426_v0 = vmov (!%p166_p2), 0.0   ;;  %s3427_s21 = smov (!%p166_p2), 111   ;;  %vm256_vm0 = vcmask (!%p166_p2), 1039360   ;;  %vm1241_vm1 = vcmask (!%p166_p2), 908288   ;;  %v2866_v12 = vld [vmem:[%s4386_s1 + $0x80] sm:$0xff] (!%p166_p2) }
   0x6   : > { %169 = sbr.rel (%p166_p2) target bundleno = 795 (0x31b), region = 32  ;;  %374 = vmatprep.mubr.f32.mxu1 (!%p166_p2), %v3426_v0  ;;  %1358 = vmatprep.mubr.f32.mxu0 (!%p166_p2), %v3426_v0  ;;  %s3428_s22 = smov (!%p166_p2), 127   ;;  %vm261_vm2 = vcmask (!%p166_p2), 64512   ;;  %v2978_v13 = vld [vmem:[%s4386_s1 + $0x200] sm:$0xff] (!%p166_p2)  ;;  %vm1510_vm3 = vcmask (!%p166_p2), 900096   ;;  %v2867_v18 = vld [vmem:[%s4386_s1 + $0x88] sm:$0xff] (!%p166_p2) }
   0x7   : > { %s3429_s23 = smov (!%p166_p2), 110   ;;  %s3430_s24 = smov (!%p166_p2), 96   ;;  %v2979_v19 = vld [vmem:[%s4386_s1 + $0x208] sm:$0xff] (!%p166_p2)  ;;  %v2980_v22 = vld [vmem:[%s4386_s1 + $0x210] sm:$0xff] (!%p166_p2)  ;;  %vm1779_vm4 = vcmask (!%p166_p2), 785408   ;;  %v2981_v26 = vld [vmem:[%s4386_s1 + $0x218] sm:$0xff] (!%p166_p2) }
   0x8   : > { %s3431_s25 = smov (!%p166_p2), 126   ;;  %s3432_s26 = smov (!%p166_p2), 95   ;;  %v2868_v23 = vld [vmem:[%s4386_s1 + $0x90] sm:$0xff] (!%p166_p2)  ;;  %v2869_v27 = vld [vmem:[%s4386_s1 + $0x98] sm:$0xff] (!%p166_p2)  ;;  %vm703_vm5 = vcmask (!%p166_p2), 1031168   ;;  %v2870_v31 = vld [vmem:[%s4386_s1 + $0xa0] sm:$0xff] (!%p166_p2) }
   0x9   : > { %s3433_s27 = smov (!%p166_p2), 112   ;;  %s3434_s28 = smov (!%p166_p2), 94   ;;  %v2982_v32 = vld [vmem:[%s4386_s1 + $0x220] sm:$0xff] (!%p166_p2)  ;;  %v2871_v36 = vld [vmem:[%s4386_s1 + $0xa8] sm:$0xff] (!%p166_p2)  ;;  %v2872_v38 = vld [vmem:[%s4386_s1 + $0xb0] sm:$0xff] (!%p166_p2)  ;;  %vm2048_vm6 = vcmask (!%p166_p2), 777216  }
   0xa   : > { %v2983_v37 = vld [vmem:[%s4386_s1 + $0x228] sm:$0xff] (!%p166_p2)  ;;  %v2984_v39 = vld [vmem:[%s4386_s1 + $0x230] sm:$0xff] (!%p166_p2)  ;;  %v2873_v40 = vld [vmem:[%s4386_s1 + $0xb8] sm:$0xff] (!%p166_p2)  ;;  %vm972_vm7 = vcmask (!%p166_p2), 916480   ;;  %vm2317_vm8 = vcmask (!%p166_p2), 769024   ;;  %vm2655_vm9 = vcmask (!%p166_p2), 7168  }
   0xb   : > { %v2985_v41 = vld [vmem:[%s4386_s1 + $0x238] sm:$0xff] (!%p166_p2)  ;;  %v2874_v43 = vld [vmem:[%s4386_s1 + $0xc0] sm:$0xff] (!%p166_p2)  ;;  %v2875_v49 = vld [vmem:[%s4386_s1 + $0xc8] sm:$0xff] (!%p166_p2) }
   0xc   : > { %v3010_v44 = vld [vmem:[%s4386_s1 + $0x280] sm:$0xff] (!%p166_p2)  ;;  %v3011_v50 = vld [vmem:[%s4386_s1 + $0x288] sm:$0xff] (!%p166_p2)  ;;  %v2876_v51 = vld [vmem:[%s4386_s1 + $0xd0] sm:$0xff] (!%p166_p2) }
   0xd   : > { %s4391_s16 = smov (!%p196_p3, %s2856_s16), 1  ;;  %v3012_v52 = vld [vmem:[%s4386_s1 + $0x290] sm:$0xff]  ;;  %v2877_v53 = vld [vmem:[%s4386_s1 + $0xd8] sm:$0xff]  ;;  %v2878_v55 = vld [vmem:[%s4386_s1 + $0xe0] sm:$0xff] }
   0xe   : > { %s3400_s17 = smul.u32 24, %s4391_s16  ;;  %v3013_v54 = vld [vmem:[%s4386_s1 + $0x298] sm:$0xff]  ;;  %v3014_v56 = vld [vmem:[%s4386_s1 + $0x2a0] sm:$0xff]  ;;  %v2879_v57 = vld [vmem:[%s4386_s1 + $0xe8] sm:$0xff]  ;;  %s3140_s5 = sshll.u32 %s4391_s16, 7 }
   0xf   : > { %v3015_v58 = vld [vmem:[%s4386_s1 + $0x2a8] sm:$0xff]  ;;  %v2880_v59 = vld [vmem:[%s4386_s1 + $0xf0] sm:$0xff]  ;;  %v2881_v62 = vld [vmem:[%s4386_s1 + $0xf8] sm:$0xff]  ;;  %s4311_s8 = scalar_lea.vmem %s4388_s3, %s3140_s5  ;;  %s4316_s11 = scalar_lea.vmem %s4389_s4, %s3140_s5 }
  0x10   : > { %s200_s20 = scalar_lea.vmem %s4385_s0, %s3400_s17  ;;  %v3016_v60 = vld [vmem:[%s4386_s1 + $0x2b0] sm:$0xff]  ;;  %v3017_v63 = vld [vmem:[%s4386_s1 + $0x2b8] sm:$0xff] }
  0x11   : > { %v3476_v1 = vld [vmem:[%s200_s20 + $0x8] sm:$0xff]  ;;  %v213_v2 = vld [vmem:[%s200_s20 + $0x10] sm:$0xff]  ;;  %v211_v3 = vld [vmem:[%s200_s20] sm:$0xff] }
  0x12   : > { %1237 = vrot.lane.b32.xlu1 %v3476_v1, %s3427_s21  ;;  %252 = vrot.lane.b32.xlu0 %v3476_v1, %s3428_s22 }
  0x16   : > { %1239 = vrot.lane.b32.xlu1 %v213_v2, %s3427_s21  ;;  %254 = vrot.lane.b32.xlu0 %v213_v2, %s3428_s22 }
  0x1a   : > { %1235 = vrot.lane.b32.xlu1 %v211_v3, %s3427_s21  ;;  %250 = vrot.lane.b32.xlu0 %v211_v3, %s3428_s22 }
  0x1e   : > { %1508 = vrot.lane.b32.xlu1 %v213_v2, %s3429_s23  ;;  %1506 = vrot.lane.b32.xlu0 %v3476_v1, %s3429_s23 }
  0x22   : > { %1504 = vrot.lane.b32.xlu0 %v211_v3, %s3429_s23  ;;  %1775 = vrot.lane.b32.xlu1 %v3476_v1, %s3430_s24 }
  0x26   : > { %1777 = vrot.lane.b32.xlu0 %v213_v2, %s3430_s24  ;;  %1773 = vrot.lane.b32.xlu1 %v211_v3, %s3430_s24 }
  0x2a   : > { %699 = vrot.lane.b32.xlu0 %v3476_v1, %s3431_s25  ;;  %701 = vrot.lane.b32.xlu1 %v213_v2, %s3431_s25 }
  0x2e   : > { %697 = vrot.lane.b32.xlu0 %v211_v3, %s3431_s25  ;;  %2044 = vrot.lane.b32.xlu1 %v3476_v1, %s3432_s26 }
  0x32   : > { %2046 = vrot.lane.b32.xlu0 %v213_v2, %s3432_s26  ;;  %2042 = vrot.lane.b32.xlu1 %v211_v3, %s3432_s26 }
  0x36   : > { %968 = vrot.lane.b32.xlu0 %v3476_v1, %s3433_s27  ;;  %970 = vrot.lane.b32.xlu1 %v213_v2, %s3433_s27 }
  0x3a   : > { %966 = vrot.lane.b32.xlu0 %v211_v3, %s3433_s27  ;;  %2313 = vrot.lane.b32.xlu1 %v3476_v1, %s3434_s28 }
  0x3e   : > { %2315 = vrot.lane.b32.xlu0 %v213_v2, %s3434_s28  ;;  %2311 = vrot.lane.b32.xlu1 %v211_v3, %s3434_s28  ;;  %v3018_v2 = vld [vmem:[%s4386_s1 + $0x2c0] sm:$0xff] }
  0x84   : > { %v1238_v4 = vpop.permute.xlu1 %1237  ;;  %v253_v5 = vpop.permute.xlu0 %252 }
  0x88   : > { %v1240_v6 = vpop.permute.xlu1 %1239  ;;  %v255_v7 = vpop.permute.xlu0 %254 }
  0x89   : > { %v258_v8 = vsel %vm256_vm0, %v253_v5, %v255_v7  ;;  %v3486_v9 = vsel %vm1241_vm1, %v1238_v4, %v1240_v6  ;;  %v215_v7 = vld [vmem:[%s4386_s1 + $0x8] sm:$0xff] }
  0x8a   : > { %310 = vmatprep.subr.mxu1 %v258_v8  ;;  %1294 = vmatprep.subr.mxu0 %v3486_v9  ;;  %v3019_v8 = vld [vmem:[%s4386_s1 + $0x2c8] sm:$0xff] }
  0x8c   : > { %v1236_v10 = vpop.permute.xlu1 %1235  ;;  %v251_v11 = vpop.permute.xlu0 %250 }
  0x8d   : > { %v257_v14 = vsel %vm256_vm0, %v251_v11, %v253_v5  ;;  %v3495_v15 = vsel %vm1241_vm1, %v1236_v10, %v1238_v4  ;;  %v216_v10 = vld [vmem:[%s4386_s1 + $0x10] sm:$0xff] }
  0x8e   : > { %311 = vmatpush1.msra.mxu1 %v257_v14  ;;  %1295 = vmatpush1.msra.mxu0 %v3495_v15  ;;  %v3020_v11 = vld [vmem:[%s4386_s1 + $0x2d0] sm:$0xff]  ;;  %v218_v14 = vld [vmem:[%s4386_s1 + $0x20] sm:$0xff] }
  0x8f   : > { %2882 = vmatmul.mubr.msk.f32.vlgmr.msra.gmra.mrb[0].mxu1 %vm261_vm2, %v2866_v12  ;;  %2994 = vmatmul.mubr.msk.f32.vlgmr.msra.gmra.mrb[0].mxu0 %vm261_vm2, %v2978_v13  ;;  %v217_v12 = vld [vmem:[%s4386_s1 + $0x18] sm:$0xff] }
  0x90   : > { %v1509_v16 = vpop.permute.xlu1 %1508  ;;  %v1507_v17 = vpop.permute.xlu0 %1506  ;;  %380 = vmatprep.mubr.f32.mxu1 %v3426_v0  ;;  %1364 = vmatprep.mubr.f32.mxu0 %v3426_v0  ;;  %v3021_v13 = vld [vmem:[%s4386_s1 + $0x2d8] sm:$0xff] }
  0x91   : > { %v1512_v20 = vsel %vm1510_vm3, %v1507_v17, %v1509_v16  ;;  %519 = vmatprep.subr.mxu1 %v3476_v1  ;;  %v214_v1 = vld [vmem:[%s4386_s1] sm:$0xff] }
  0x92   : > { %1563 = vmatprep.subr.mxu0 %v1512_v20  ;;  %520 = vmatpush1.msra.mxu1 %v211_v3  ;;  %v3022_v16 = vld [vmem:[%s4386_s1 + $0x2e0] sm:$0xff]  ;;  %v3024_v20 = vld [vmem:[%s4386_s1 + $0x2f0] sm:$0xff] }
  0x93   : > { %2883 = vmatmul.mubr.msk.f32.gmra.mrb[2].mxu1 %vm261_vm2, %v2867_v18  ;;  %2995 = vmatmul.mubr.msk.f32.gmra.mrb[2].mxu0 %vm261_vm2, %v2979_v19  ;;  %v3023_v18 = vld [vmem:[%s4386_s1 + $0x2e8] sm:$0xff]  ;;  %v220_v19 = vld [vmem:[%s4386_s1 + $0x30] sm:$0xff] }
  0x94   : > { %v1505_v21 = vpop.permute.xlu0 %1504  ;;  %386 = vmatprep.mubr.f32.mxu1 %v3426_v0  ;;  %1370 = vmatprep.mubr.f32.mxu0 %v3426_v0  ;;  %v1776_v24 = vpop.permute.xlu1 %1775 }
  0x95   : > { %v1511_v25 = vsel %vm1510_vm3, %v1505_v21, %v1507_v17  ;;  %v219_v17 = vld [vmem:[%s4386_s1 + $0x28] sm:$0xff]  ;;  %v221_v21 = vld [vmem:[%s4386_s1 + $0x38] sm:$0xff] }
  0x96   : > { %1564 = vmatpush1.msra.mxu0 %v1511_v25  ;;  %v3042_v25 = vld [vmem:[%s4386_s1 + $0x300] sm:$0xff] }
  0x97   : > { %2996 = vmatmul.mubr.msk.f32.gmra.mrb[4].mxu0 %vm261_vm2, %v2980_v22  ;;  %2884 = vmatmul.mubr.msk.f32.gmra.mrb[4].mxu1 %vm261_vm2, %v2868_v23  ;;  %v3025_v22 = vld [vmem:[%s4386_s1 + $0x2f8] sm:$0xff] }
  0x98   : > { %392 = vmatprep.mubr.f32.mxu1 %v3426_v0  ;;  %1376 = vmatprep.mubr.f32.mxu0 %v3426_v0  ;;  %v1778_v28 = vpop.permute.xlu0 %1777  ;;  %v1774_v29 = vpop.permute.xlu1 %1773 }
  0x99   : > { %v1781_v30 = vsel %vm1779_vm4, %v1776_v24, %v1778_v28  ;;  %v1780_v45 = vsel %vm1779_vm4, %v1774_v29, %v1776_v24  ;;  %v222_v24 = vld [vmem:[%s4386_s1 + $0x40] sm:$0xff] }
  0x9a   : > { %1832 = vmatprep.subr.mxu0 %v1781_v30  ;;  %v223_v30 = vld [vmem:[%s4386_s1 + $0x48] sm:$0xff] }
  0x9b   : > { %2997 = vmatmul.mubr.msk.f32.gmra.mrb[6].mxu0 %vm261_vm2, %v2981_v26  ;;  %2885 = vmatmul.mubr.msk.f32.gmra.mrb[6].mxu1 %vm261_vm2, %v2869_v27 }
  0x9c   : > { %398 = vmatprep.mubr.f32.mxu1 %v3426_v0  ;;  %1382 = vmatprep.mubr.f32.mxu0 %v3426_v0  ;;  %v3542_v33 = vpop.permute.xlu0 %699  ;;  %v702_v34 = vpop.permute.xlu1 %701 }
  0x9d   : > { %v705_v35 = vsel %vm703_vm5, %v3542_v33, %v702_v34  ;;  %v225_v34 = vld [vmem:[%s4386_s1 + $0x58] sm:$0xff] }
  0x9e   : > { %756 = vmatprep.subr.mxu1 %v705_v35  ;;  %v3045_v35 = vld [vmem:[%s4386_s1 + $0x318] sm:$0xff] }
  0x9f   : > { %2886 = vmatmul.mubr.msk.f32.gmra.mrb[8].mxu1 %vm261_vm2, %v2870_v31  ;;  %2998 = vmatmul.mubr.msk.f32.gmra.mrb[8].mxu0 %vm261_vm2, %v2982_v32  ;;  %v3043_v31 = vld [vmem:[%s4386_s1 + $0x308] sm:$0xff]  ;;  %v224_v32 = vld [vmem:[%s4386_s1 + $0x50] sm:$0xff] }
  0xa0   : > { %404 = vmatprep.mubr.f32.mxu1 %v3426_v0  ;;  %1388 = vmatprep.mubr.f32.mxu0 %v3426_v0  ;;  %v3576_v42 = vpop.permute.xlu0 %697  ;;  %v3589_v46 = vpop.permute.xlu1 %2044 }
  0xa1   : > { %v704_v4 = vsel %vm703_vm5, %v3576_v42, %v3542_v33  ;;  %v3044_v33 = vld [vmem:[%s4386_s1 + $0x310] sm:$0xff]  ;;  %v229_v42 = vld [vmem:[%s4386_s1 + $0x78] sm:$0xff] }
  0xa3   : > { %2887 = vmatmul.mubr.msk.f32.gmra.mrb[10].mxu1 %vm261_vm2, %v2871_v36  ;;  %2999 = vmatmul.mubr.msk.f32.gmra.mrb[10].mxu0 %vm261_vm2, %v2983_v37  ;;  %v226_v36 = vld [vmem:[%s4386_s1 + $0x60] sm:$0xff] }
  0xa4   : > { %410 = vmatprep.mubr.f32.mxu1 %v3426_v0  ;;  %1394 = vmatprep.mubr.f32.mxu0 %v3426_v0  ;;  %v2047_v47 = vpop.permute.xlu0 %2046  ;;  %v3653_v61 = vpop.permute.xlu1 %2042  ;;  %v3046_v37 = vld [vmem:[%s4386_s1 + $0x320] sm:$0xff] }
  0xa5   : > { %v2050_v48 = vsel %vm2048_vm6, %v3589_v46, %v2047_v47  ;;  %v2049_v27 = vsel %vm2048_vm6, %v3653_v61, %v3589_v46  ;;  %v2915_v47 = vld [vmem:[%s4386_s1 + $0x108] sm:$0xff]  ;;  %v2922_v61 = vld [vmem:[%s4386_s1 + $0x140] sm:$0xff] }
  0xa7   : > { %2888 = vmatmul.mubr.msk.f32.gmra.mrb[12].mxu1 %vm261_vm2, %v2872_v38  ;;  %3000 = vmatmul.mubr.msk.f32.gmra.mrb[12].mxu0 %vm261_vm2, %v2984_v39  ;;  %v227_v38 = vld [vmem:[%s4386_s1 + $0x68] sm:$0xff] }
  0xa8   : > { %416 = vmatprep.mubr.f32.mxu1 %v3426_v0  ;;  %1400 = vmatprep.mubr.f32.mxu0 %v3426_v0  ;;  %v971_v3 = vpop.permute.xlu1 %970  ;;  %v3678_v5 = vpop.permute.xlu0 %968  ;;  %v3047_v39 = vld [vmem:[%s4386_s1 + $0x328] sm:$0xff] }
  0xa9   : > { %v974_v6 = vsel %vm972_vm7, %v3678_v5, %v971_v3  ;;  %v2924_v3 = vld [vmem:[%s4386_s1 + $0x150] sm:$0xff] }
  0xab   : > { %2889 = vmatmul.mubr.msk.f32.gmra.mrb[14].mxu1 %vm261_vm2, %v2873_v40  ;;  %3001 = vmatmul.mubr.msk.f32.gmra.mrb[14].mxu0 %vm261_vm2, %v2985_v41  ;;  %v228_v40 = vld [vmem:[%s4386_s1 + $0x70] sm:$0xff] }
  0xac   : > { %422 = vmatprep.mubr.f32.mxu1 %v3426_v0  ;;  %1627 = vmatprep.mubr.f32.mxu0 %v3426_v0  ;;  %v3752_v23 = vpop.permute.xlu0 %966  ;;  %v3767_v28 = vpop.permute.xlu1 %2313  ;;  %v3048_v41 = vld [vmem:[%s4386_s1 + $0x330] sm:$0xff] }
  0xad   : > { %v973_v46 = vsel %vm972_vm7, %v3752_v23, %v3678_v5  ;;  %v2925_v5 = vld [vmem:[%s4386_s1 + $0x158] sm:$0xff] }
  0xae   : > { %v3085_v23 = vld [vmem:[%s4386_s1 + $0x3d8] sm:$0xff] }
  0xaf   : > { %2890 = vmatmul.mubr.msk.f32.gmra.mrb[16].mxu1 %vm261_vm2, %v2874_v43  ;;  %3026 = vmatmul.mubr.msk.f32.vlgmr.msra.gmra.mrb[0].mxu0 %vm261_vm2, %v3010_v44  ;;  %v3049_v43 = vld [vmem:[%s4386_s1 + $0x338] sm:$0xff]  ;;  %v2914_v44 = vld [vmem:[%s4386_s1 + $0x100] sm:$0xff] }
  0xb0   : > { %428 = vmatprep.mubr.f32.mxu1 %v3426_v0  ;;  %1633 = vmatprep.mubr.f32.mxu0 %v3426_v0  ;;  %v2316_v26 = vpop.permute.xlu0 %2315 }
  0xb1   : > { %1833 = vmatpush1.msra.mxu0 %v1780_v45  ;;  %v2319_v29 = vsel %vm2317_vm8, %v3767_v28, %v2316_v26  ;;  %v3050_v45 = vld [vmem:[%s4386_s1 + $0x340] sm:$0xff]  ;;  %v2951_v26 = vld [vmem:[%s4386_s1 + $0x1a8] sm:$0xff] }
  0xb2   : > { %2101 = vmatprep.subr.mxu0 %v2050_v48  ;;  %v3051_v48 = vld [vmem:[%s4386_s1 + $0x348] sm:$0xff] }
  0xb3   : > { %2891 = vmatmul.mubr.msk.f32.gmra.mrb[18].mxu1 %vm261_vm2, %v2875_v49  ;;  %3027 = vmatmul.mubr.msk.f32.gmra.mrb[2].mxu0 %vm261_vm2, %v3011_v50  ;;  %v2916_v49 = vld [vmem:[%s4386_s1 + $0x110] sm:$0xff] }
  0xb4   : > { %434 = vmatprep.mubr.f32.mxu1 %v3426_v0  ;;  %1639 = vmatprep.mubr.f32.mxu0 %v3426_v0  ;;  %v3052_v50 = vld [vmem:[%s4386_s1 + $0x350] sm:$0xff] }
  0xb7   : > { %2892 = vmatmul.mubr.msk.f32.gmra.mrb[20].mxu1 %vm261_vm2, %v2876_v51  ;;  %3028 = vmatmul.mubr.msk.f32.gmra.mrb[4].mxu0 %vm261_vm2, %v3012_v52  ;;  %v3053_v51 = vld [vmem:[%s4386_s1 + $0x358] sm:$0xff]  ;;  %v2918_v52 = vld [vmem:[%s4386_s1 + $0x120] sm:$0xff] }
  0xb8   : > { %440 = vmatprep.mubr.f32.mxu1 %v3426_v0  ;;  %1645 = vmatprep.mubr.f32.mxu0 %v3426_v0 }
  0xbb   : > { %2893 = vmatmul.mubr.msk.f32.gmra.mrb[22].mxu1 %vm261_vm2, %v2877_v53  ;;  %3029 = vmatmul.mubr.msk.f32.gmra.mrb[6].mxu0 %vm261_vm2, %v3013_v54  ;;  %v3054_v53 = vld [vmem:[%s4386_s1 + $0x360] sm:$0xff]  ;;  %v2919_v54 = vld [vmem:[%s4386_s1 + $0x128] sm:$0xff] }
  0xbc   : > { %446 = vmatprep.mubr.f32.mxu1 %v3426_v0  ;;  %1651 = vmatprep.mubr.f32.mxu0 %v3426_v0 }
  0xbf   : > { %2894 = vmatmul.mubr.msk.f32.gmra.mrb[24].mxu1 %vm261_vm2, %v2878_v55  ;;  %3030 = vmatmul.mubr.msk.f32.gmra.mrb[8].mxu0 %vm261_vm2, %v3014_v56  ;;  %v3055_v55 = vld [vmem:[%s4386_s1 + $0x368] sm:$0xff]  ;;  %v2920_v56 = vld [vmem:[%s4386_s1 + $0x130] sm:$0xff] }
  0xc0   : > { %452 = vmatprep.mubr.f32.mxu1 %v3426_v0  ;;  %1657 = vmatprep.mubr.f32.mxu0 %v3426_v0 }
  0xc3   : > { %2895 = vmatmul.mubr.msk.f32.gmra.mrb[26].mxu1 %vm261_vm2, %v2879_v57  ;;  %3031 = vmatmul.mubr.msk.f32.gmra.mrb[10].mxu0 %vm261_vm2, %v3015_v58  ;;  %v3056_v57 = vld [vmem:[%s4386_s1 + $0x370] sm:$0xff]  ;;  %v2921_v58 = vld [vmem:[%s4386_s1 + $0x138] sm:$0xff] }
  0xc4   : > { %458 = vmatprep.mubr.f32.mxu1 %v3426_v0  ;;  %1663 = vmatprep.mubr.f32.mxu0 %v3426_v0 }
  0xc7   : > { %2896 = vmatmul.mubr.msk.f32.gmra.mrb[28].mxu1 %vm261_vm2, %v2880_v59  ;;  %3032 = vmatmul.mubr.msk.f32.gmra.mrb[12].mxu0 %vm261_vm2, %v3016_v60  ;;  %v3057_v59 = vld [vmem:[%s4386_s1 + $0x378] sm:$0xff]  ;;  %v2312_v60 = vpop.permute.xlu1 %2311 }
  0xc8   : > { %464 = vmatprep.mubr.f32.mxu1 %v3426_v0  ;;  %1669 = vmatprep.mubr.f32.mxu0 %v3426_v0 }
  0xcb   : > { %2897 = vmatmul.mubr.msk.f32.gmra.mrb[30].mxu1 %vm261_vm2, %v2881_v62  ;;  %3033 = vmatmul.mubr.msk.f32.gmra.mrb[14].mxu0 %vm261_vm2, %v3017_v63  ;;  %v3074_v62 = vld [vmem:[%s4386_s1 + $0x380] sm:$0xff]  ;;  %v2318_v63 = vsel %vm2317_vm8, %v2312_v60, %v3767_v28  ;;  %v2952_v28 = vld [vmem:[%s4386_s1 + $0x1b0] sm:$0xff] }
  0xcc   : > { %583 = vmatprep.mubr.f32.mxu1 %v3426_v0  ;;  %1675 = vmatprep.mubr.f32.mxu0 %v3426_v0  ;;  %v3120_v60 = vld [vmem:[%s4386_s1 + $0x470] sm:$0xff] }
  0xcf   : > { %2898 = vmatmul.mubr.msk.f32.vlgmr.msra.gmra.mrb[0].mxu1 %vm261_vm2, %v214_v1  ;;  %3034 = vmatmul.mubr.msk.f32.gmra.mrb[16].mxu0 %vm261_vm2, %v3018_v2  ;;  %v2923_v1 = vld [vmem:[%s4386_s1 + $0x148] sm:$0xff] }
  0xd0   : > { %589 = vmatprep.mubr.f32.mxu1 %v3426_v0  ;;  %1681 = vmatprep.mubr.f32.mxu0 %v3426_v0  ;;  %v3075_v2 = vld [vmem:[%s4386_s1 + $0x388] sm:$0xff] }
  0xd1   : > { %757 = vmatpush1.msra.mxu1 %v704_v4  ;;  %v3076_v4 = vld [vmem:[%s4386_s1 + $0x390] sm:$0xff] }
  0xd2   : > { %1025 = vmatprep.subr.mxu1 %v974_v6  ;;  %v3077_v6 = vld [vmem:[%s4386_s1 + $0x398] sm:$0xff] }
  0xd3   : > { %2899 = vmatmul.mubr.msk.f32.gmra.mrb[2].mxu1 %vm261_vm2, %v215_v7  ;;  %3035 = vmatmul.mubr.msk.f32.gmra.mrb[18].mxu0 %vm261_vm2, %v3019_v8  ;;  %v2926_v7 = vld [vmem:[%s4386_s1 + $0x160] sm:$0xff] }
  0xd4   : > { %595 = vmatprep.mubr.f32.mxu1 %v3426_v0  ;;  %1687 = vmatprep.mubr.f32.mxu0 %v3426_v0  ;;  %v3078_v8 = vld [vmem:[%s4386_s1 + $0x3a0] sm:$0xff] }
  0xd7   : > { %2900 = vmatmul.mubr.msk.f32.gmra.mrb[4].mxu1 %vm261_vm2, %v216_v10  ;;  %3036 = vmatmul.mubr.msk.f32.gmra.mrb[20].mxu0 %vm261_vm2, %v3020_v11  ;;  %v2927_v10 = vld [vmem:[%s4386_s1 + $0x168] sm:$0xff] }
  0xd8   : > { %601 = vmatprep.mubr.f32.mxu1 %v3426_v0  ;;  %1693 = vmatprep.mubr.f32.mxu0 %v3426_v0  ;;  %v3079_v11 = vld [vmem:[%s4386_s1 + $0x3a8] sm:$0xff] }
  0xdb   : > { %2901 = vmatmul.mubr.msk.f32.gmra.mrb[6].mxu1 %vm261_vm2, %v217_v12  ;;  %3037 = vmatmul.mubr.msk.f32.gmra.mrb[22].mxu0 %vm261_vm2, %v3021_v13  ;;  %v2928_v12 = vld [vmem:[%s4386_s1 + $0x170] sm:$0xff] }
  0xdc   : > { %607 = vmatprep.mubr.f32.mxu1 %v3426_v0  ;;  %1699 = vmatprep.mubr.f32.mxu0 %v3426_v0  ;;  %v3080_v13 = vld [vmem:[%s4386_s1 + $0x3b0] sm:$0xff] }
  0xdf   : > { %2902 = vmatmul.mubr.msk.f32.gmra.mrb[8].mxu1 %vm261_vm2, %v218_v14  ;;  %3038 = vmatmul.mubr.msk.f32.gmra.mrb[24].mxu0 %vm261_vm2, %v3022_v16  ;;  %v2929_v14 = vld [vmem:[%s4386_s1 + $0x178] sm:$0xff] }
  0xe0   : > { %613 = vmatprep.mubr.f32.mxu1 %v3426_v0  ;;  %1705 = vmatprep.mubr.f32.mxu0 %v3426_v0  ;;  %v3081_v16 = vld [vmem:[%s4386_s1 + $0x3b8] sm:$0xff] }
  0xe3   : > { %2903 = vmatmul.mubr.msk.f32.gmra.mrb[10].mxu1 %vm261_vm2, %v219_v17  ;;  %3039 = vmatmul.mubr.msk.f32.gmra.mrb[26].mxu0 %vm261_vm2, %v3023_v18  ;;  %v2946_v17 = vld [vmem:[%s4386_s1 + $0x180] sm:$0xff] }
  0xe4   : > { %619 = vmatprep.mubr.f32.mxu1 %v3426_v0  ;;  %1711 = vmatprep.mubr.f32.mxu0 %v3426_v0  ;;  %v3082_v18 = vld [vmem:[%s4386_s1 + $0x3c0] sm:$0xff] }
  0xe7   : > { %2904 = vmatmul.mubr.msk.f32.gmra.mrb[12].mxu1 %vm261_vm2, %v220_v19  ;;  %3040 = vmatmul.mubr.msk.f32.gmra.mrb[28].mxu0 %vm261_vm2, %v3024_v20  ;;  %v2947_v19 = vld [vmem:[%s4386_s1 + $0x188] sm:$0xff] }
  0xe8   : > { %625 = vmatprep.mubr.f32.mxu1 %v3426_v0  ;;  %1717 = vmatprep.mubr.f32.mxu0 %v3426_v0  ;;  %v3083_v20 = vld [vmem:[%s4386_s1 + $0x3c8] sm:$0xff] }
  0xeb   : > { %2905 = vmatmul.mubr.msk.f32.gmra.mrb[14].mxu1 %vm261_vm2, %v221_v21  ;;  %3041 = vmatmul.mubr.msk.f32.gmra.mrb[30].mxu0 %vm261_vm2, %v3025_v22  ;;  %v3084_v21 = vld [vmem:[%s4386_s1 + $0x3d0] sm:$0xff]  ;;  %v2949_v22 = vld [vmem:[%s4386_s1 + $0x198] sm:$0xff] }
  0xec   : > { %631 = vmatprep.mubr.f32.mxu1 %v3426_v0  ;;  %1896 = vmatprep.mubr.f32.mxu0 %v3426_v0 }
  0xef   : > { %2906 = vmatmul.mubr.msk.f32.gmra.mrb[16].mxu1 %vm261_vm2, %v222_v24  ;;  %3058 = vmatmul.mubr.msk.f32.vlgmr.msra.gmra.mrb[0].mxu0 %vm261_vm2, %v3042_v25  ;;  %v2950_v24 = vld [vmem:[%s4386_s1 + $0x1a0] sm:$0xff] }
  0xf0   : > { %637 = vmatprep.mubr.f32.mxu1 %v3426_v0  ;;  %1902 = vmatprep.mubr.f32.mxu0 %v3426_v0  ;;  %v3086_v25 = vld [vmem:[%s4386_s1 + $0x3e0] sm:$0xff] }
  0xf1   : > { %2102 = vmatpush1.msra.mxu0 %v2049_v27  ;;  %v3087_v27 = vld [vmem:[%s4386_s1 + $0x3e8] sm:$0xff] }
  0xf2   : > { %2370 = vmatprep.subr.mxu0 %v2319_v29  ;;  %v3088_v29 = vld [vmem:[%s4386_s1 + $0x3f0] sm:$0xff] }
  0xf3   : > { %2907 = vmatmul.mubr.msk.f32.gmra.mrb[18].mxu1 %vm261_vm2, %v223_v30  ;;  %3059 = vmatmul.mubr.msk.f32.gmra.mrb[2].mxu0 %vm261_vm2, %v3043_v31  ;;  %v2953_v30 = vld [vmem:[%s4386_s1 + $0x1b8] sm:$0xff] }
  0xf4   : > { %643 = vmatprep.mubr.f32.mxu1 %v3426_v0  ;;  %1908 = vmatprep.mubr.f32.mxu0 %v3426_v0  ;;  %v3089_v31 = vld [vmem:[%s4386_s1 + $0x3f8] sm:$0xff] }
  0xf7   : > { %2908 = vmatmul.mubr.msk.f32.gmra.mrb[20].mxu1 %vm261_vm2, %v224_v32  ;;  %3060 = vmatmul.mubr.msk.f32.gmra.mrb[4].mxu0 %vm261_vm2, %v3044_v33  ;;  %v2954_v32 = vld [vmem:[%s4386_s1 + $0x1c0] sm:$0xff] }
  0xf8   : > { %649 = vmatprep.mubr.f32.mxu1 %v3426_v0  ;;  %1914 = vmatprep.mubr.f32.mxu0 %v3426_v0  ;;  %v3106_v33 = vld [vmem:[%s4386_s1 + $0x400] sm:$0xff] }
  0xfb   : > { %2909 = vmatmul.mubr.msk.f32.gmra.mrb[22].mxu1 %vm261_vm2, %v225_v34  ;;  %3061 = vmatmul.mubr.msk.f32.gmra.mrb[6].mxu0 %vm261_vm2, %v3045_v35  ;;  %v2955_v34 = vld [vmem:[%s4386_s1 + $0x1c8] sm:$0xff] }
  0xfc   : > { %655 = vmatprep.mubr.f32.mxu1 %v3426_v0  ;;  %1920 = vmatprep.mubr.f32.mxu0 %v3426_v0  ;;  %v3107_v35 = vld [vmem:[%s4386_s1 + $0x408] sm:$0xff] }
  0xff   : > { %2910 = vmatmul.mubr.msk.f32.gmra.mrb[24].mxu1 %vm261_vm2, %v226_v36  ;;  %3062 = vmatmul.mubr.msk.f32.gmra.mrb[8].mxu0 %vm261_vm2, %v3046_v37  ;;  %v2956_v36 = vld [vmem:[%s4386_s1 + $0x1d0] sm:$0xff] }
 0x100   : > { %661 = vmatprep.mubr.f32.mxu1 %v3426_v0  ;;  %1926 = vmatprep.mubr.f32.mxu0 %v3426_v0  ;;  %v3108_v37 = vld [vmem:[%s4386_s1 + $0x410] sm:$0xff] }
 0x103   : > { %2911 = vmatmul.mubr.msk.f32.gmra.mrb[26].mxu1 %vm261_vm2, %v227_v38  ;;  %3063 = vmatmul.mubr.msk.f32.gmra.mrb[10].mxu0 %vm261_vm2, %v3047_v39  ;;  %v2957_v38 = vld [vmem:[%s4386_s1 + $0x1d8] sm:$0xff] }
 0x104   : > { %667 = vmatprep.mubr.f32.mxu1 %v3426_v0  ;;  %1932 = vmatprep.mubr.f32.mxu0 %v3426_v0  ;;  %v3109_v39 = vld [vmem:[%s4386_s1 + $0x418] sm:$0xff] }
 0x107   : > { %2912 = vmatmul.mubr.msk.f32.gmra.mrb[28].mxu1 %vm261_vm2, %v228_v40  ;;  %3064 = vmatmul.mubr.msk.f32.gmra.mrb[12].mxu0 %vm261_vm2, %v3048_v41  ;;  %v2958_v40 = vld [vmem:[%s4386_s1 + $0x1e0] sm:$0xff] }
 0x108   : > { %673 = vmatprep.mubr.f32.mxu1 %v3426_v0  ;;  %1938 = vmatprep.mubr.f32.mxu0 %v3426_v0  ;;  %v3110_v41 = vld [vmem:[%s4386_s1 + $0x420] sm:$0xff] }
 0x10b   : > { %2913 = vmatmul.mubr.msk.f32.gmra.mrb[30].mxu1 %vm261_vm2, %v229_v42  ;;  %3065 = vmatmul.mubr.msk.f32.gmra.mrb[14].mxu0 %vm261_vm2, %v3049_v43  ;;  %v2959_v42 = vld [vmem:[%s4386_s1 + $0x1e8] sm:$0xff] }
 0x10c   : > { %820 = vmatprep.mubr.f32.mxu1 %v3426_v0  ;;  %1944 = vmatprep.mubr.f32.mxu0 %v3426_v0  ;;  %v3111_v43 = vld [vmem:[%s4386_s1 + $0x428] sm:$0xff] }
 0x10f   : > { %2930 = vmatmul.mubr.msk.f32.vlgmr.msra.gmra.mrb[0].mxu1 %vm261_vm2, %v2914_v44  ;;  %3066 = vmatmul.mubr.msk.f32.gmra.mrb[16].mxu0 %vm261_vm2, %v3050_v45  ;;  %v2960_v44 = vld [vmem:[%s4386_s1 + $0x1f0] sm:$0xff] }
 0x110   : > { %1026 = vmatpush1.msra.mxu1 %v973_v46  ;;  %826 = vmatprep.mubr.f32.mxu1 %v3426_v0  ;;  %v3112_v45 = vld [vmem:[%s4386_s1 + $0x430] sm:$0xff]  ;;  %v2961_v46 = vld [vmem:[%s4386_s1 + $0x1f8] sm:$0xff] }
 0x111   : > { %3142 = vmatprep.subr.mxu1 %v3486_v9  ;;  %1950 = vmatprep.mubr.f32.mxu0 %v3426_v0  ;;  %v2917_v9 = vld [vmem:[%s4386_s1 + $0x118] sm:$0xff] }
 0x113   : > { %2931 = vmatmul.mubr.msk.f32.gmra.mrb[2].mxu1 %vm261_vm2, %v2915_v47  ;;  %3067 = vmatmul.mubr.msk.f32.gmra.mrb[18].mxu0 %vm261_vm2, %v3051_v48  ;;  %v3113_v47 = vld [vmem:[%s4386_s1 + $0x438] sm:$0xff]  ;;  %v2986_v48 = vld [vmem:[%s4386_s1 + $0x240] sm:$0xff] }
 0x114   : > { %832 = vmatprep.mubr.f32.mxu1 %v3426_v0  ;;  %1956 = vmatprep.mubr.f32.mxu0 %v3426_v0 }
 0x117   : > { %2932 = vmatmul.mubr.msk.f32.gmra.mrb[4].mxu1 %vm261_vm2, %v2916_v49  ;;  %3068 = vmatmul.mubr.msk.f32.gmra.mrb[20].mxu0 %vm261_vm2, %v3052_v50  ;;  %v3114_v49 = vld [vmem:[%s4386_s1 + $0x440] sm:$0xff]  ;;  %v2987_v50 = vld [vmem:[%s4386_s1 + $0x248] sm:$0xff] }
 0x118   : > { %838 = vmatprep.mubr.f32.mxu1 %v3426_v0  ;;  %1962 = vmatprep.mubr.f32.mxu0 %v3426_v0 }
 0x11b   : > { %2933 = vmatmul.mubr.msk.f32.gmra.mrb[6].mxu1 %vm261_vm2, %v2917_v9  ;;  %3069 = vmatmul.mubr.msk.f32.gmra.mrb[22].mxu0 %vm261_vm2, %v3053_v51  ;;  %v3115_v9 = vld [vmem:[%s4386_s1 + $0x448] sm:$0xff]  ;;  %v2988_v51 = vld [vmem:[%s4386_s1 + $0x250] sm:$0xff] }
 0x11c   : > { %844 = vmatprep.mubr.f32.mxu1 %v3426_v0  ;;  %1968 = vmatprep.mubr.f32.mxu0 %v3426_v0 }
 0x11f   : > { %2934 = vmatmul.mubr.msk.f32.gmra.mrb[8].mxu1 %vm261_vm2, %v2918_v52  ;;  %3070 = vmatmul.mubr.msk.f32.gmra.mrb[24].mxu0 %vm261_vm2, %v3054_v53  ;;  %v3116_v52 = vld [vmem:[%s4386_s1 + $0x450] sm:$0xff]  ;;  %v2989_v53 = vld [vmem:[%s4386_s1 + $0x258] sm:$0xff] }
 0x120   : > { %850 = vmatprep.mubr.f32.mxu1 %v3426_v0  ;;  %1974 = vmatprep.mubr.f32.mxu0 %v3426_v0 }
 0x123   : > { %2935 = vmatmul.mubr.msk.f32.gmra.mrb[10].mxu1 %vm261_vm2, %v2919_v54  ;;  %3071 = vmatmul.mubr.msk.f32.gmra.mrb[26].mxu0 %vm261_vm2, %v3055_v55  ;;  %v3117_v54 = vld [vmem:[%s4386_s1 + $0x458] sm:$0xff]  ;;  %v2990_v55 = vld [vmem:[%s4386_s1 + $0x260] sm:$0xff] }
 0x124   : > { %856 = vmatprep.mubr.f32.mxu1 %v3426_v0  ;;  %1980 = vmatprep.mubr.f32.mxu0 %v3426_v0 }
 0x127   : > { %2936 = vmatmul.mubr.msk.f32.gmra.mrb[12].mxu1 %vm261_vm2, %v2920_v56  ;;  %3072 = vmatmul.mubr.msk.f32.gmra.mrb[28].mxu0 %vm261_vm2, %v3056_v57  ;;  %v3118_v56 = vld [vmem:[%s4386_s1 + $0x460] sm:$0xff]  ;;  %v2991_v57 = vld [vmem:[%s4386_s1 + $0x268] sm:$0xff] }
 0x128   : > { %862 = vmatprep.mubr.f32.mxu1 %v3426_v0  ;;  %1986 = vmatprep.mubr.f32.mxu0 %v3426_v0 }
 0x12b   : > { %2937 = vmatmul.mubr.msk.f32.gmra.mrb[14].mxu1 %vm261_vm2, %v2921_v58  ;;  %3073 = vmatmul.mubr.msk.f32.gmra.mrb[30].mxu0 %vm261_vm2, %v3057_v59  ;;  %v3119_v58 = vld [vmem:[%s4386_s1 + $0x468] sm:$0xff]  ;;  %v2992_v59 = vld [vmem:[%s4386_s1 + $0x270] sm:$0xff] }
 0x12c   : > { %868 = vmatprep.mubr.f32.mxu1 %v3426_v0  ;;  %2165 = vmatprep.mubr.f32.mxu0 %v3426_v0 }
 0x12f   : > { %2938 = vmatmul.mubr.msk.f32.gmra.mrb[16].mxu1 %vm261_vm2, %v2922_v61  ;;  %3090 = vmatmul.mubr.msk.f32.vlgmr.msra.gmra.mrb[0].mxu0 %vm261_vm2, %v3074_v62  ;;  %v2993_v61 = vld [vmem:[%s4386_s1 + $0x278] sm:$0xff] }
 0x130   : > { %874 = vmatprep.mubr.f32.mxu1 %v3426_v0  ;;  %2171 = vmatprep.mubr.f32.mxu0 %v3426_v0  ;;  %v3121_v62 = vld [vmem:[%s4386_s1 + $0x478] sm:$0xff] }
 0x131   : > { %2371 = vmatpush1.msra.mxu0 %v2318_v63 }
 0x133   : > { %2939 = vmatmul.mubr.msk.f32.gmra.mrb[18].mxu1 %vm261_vm2, %v2923_v1  ;;  %3091 = vmatmul.mubr.msk.f32.gmra.mrb[2].mxu0 %vm261_vm2, %v3075_v2 }
 0x134   : > { %880 = vmatprep.mubr.f32.mxu1 %v3426_v0  ;;  %2177 = vmatprep.mubr.f32.mxu0 %v3426_v0 }
 0x137   : > { %2940 = vmatmul.mubr.msk.f32.gmra.mrb[20].mxu1 %vm261_vm2, %v2924_v3  ;;  %3092 = vmatmul.mubr.msk.f32.gmra.mrb[4].mxu0 %vm261_vm2, %v3076_v4 }
 0x138   : > { %886 = vmatprep.mubr.f32.mxu1 %v3426_v0  ;;  %2183 = vmatprep.mubr.f32.mxu0 %v3426_v0 }
 0x13b   : > { %2941 = vmatmul.mubr.msk.f32.gmra.mrb[22].mxu1 %vm261_vm2, %v2925_v5  ;;  %3093 = vmatmul.mubr.msk.f32.gmra.mrb[6].mxu0 %vm261_vm2, %v3077_v6 }
 0x13c   : > { %892 = vmatprep.mubr.f32.mxu1 %v3426_v0  ;;  %2189 = vmatprep.mubr.f32.mxu0 %v3426_v0 }
 0x13f   : > { %2942 = vmatmul.mubr.msk.f32.gmra.mrb[24].mxu1 %vm261_vm2, %v2926_v7  ;;  %3094 = vmatmul.mubr.msk.f32.gmra.mrb[8].mxu0 %vm261_vm2, %v3078_v8 }
 0x140   : > { %898 = vmatprep.mubr.f32.mxu1 %v3426_v0  ;;  %2195 = vmatprep.mubr.f32.mxu0 %v3426_v0 }
 0x143   : > { %2943 = vmatmul.mubr.msk.f32.gmra.mrb[26].mxu1 %vm261_vm2, %v2927_v10  ;;  %3095 = vmatmul.mubr.msk.f32.gmra.mrb[10].mxu0 %vm261_vm2, %v3079_v11  ;;  %v2565_v10 = vlaneseq }
 0x144   : > { %904 = vmatprep.mubr.f32.mxu1 %v3426_v0  ;;  %2201 = vmatprep.mubr.f32.mxu0 %v3426_v0 }
 0x147   : > { %2944 = vmatmul.mubr.msk.f32.gmra.mrb[28].mxu1 %vm261_vm2, %v2928_v12  ;;  %3096 = vmatmul.mubr.msk.f32.gmra.mrb[12].mxu0 %vm261_vm2, %v3080_v13  ;;  %v2566_v13 = vshrl.u32 %v2565_v10, 7 }
 0x148   : > { %910 = vmatprep.mubr.f32.mxu1 %v3426_v0  ;;  %2207 = vmatprep.mubr.f32.mxu0 %v3426_v0 }
 0x14b   : > { %2945 = vmatmul.mubr.msk.f32.gmra.mrb[30].mxu1 %vm261_vm2, %v2929_v14  ;;  %3097 = vmatmul.mubr.msk.f32.gmra.mrb[14].mxu0 %vm261_vm2, %v3081_v16 }
 0x14c   : > { %1089 = vmatprep.mubr.f32.mxu1 %v3426_v0  ;;  %2213 = vmatprep.mubr.f32.mxu0 %v3426_v0 }
 0x14f   : > { %2962 = vmatmul.mubr.msk.f32.vlgmr.msra.gmra.mrb[0].mxu1 %vm261_vm2, %v2946_v17  ;;  %3098 = vmatmul.mubr.msk.f32.gmra.mrb[16].mxu0 %vm261_vm2, %v3082_v18  ;;  %v2567_v17 = vsub.s32 0, %v2566_v13 }
 0x150   : > { %3143 = vmatpush1.msra.mxu1 %v3495_v15  ;;  %1095 = vmatprep.mubr.f32.mxu1 %v3426_v0  ;;  %v2948_v15 = vld [vmem:[%s4386_s1 + $0x190] sm:$0xff] }
 0x151   : > { %2219 = vmatprep.mubr.f32.mxu0 %v3426_v0 }
 0x153   : > { %2963 = vmatmul.mubr.msk.f32.gmra.mrb[2].mxu1 %vm261_vm2, %v2947_v19  ;;  %3099 = vmatmul.mubr.msk.f32.gmra.mrb[18].mxu0 %vm261_vm2, %v3083_v20  ;;  %v2563_v19 = vld [vmem:[%s4387_s2] sm:$0x3]  ;;  %v2571_v20 = vsub.s32 1, %v2566_v13 }
 0x154   : > { %1101 = vmatprep.mubr.f32.mxu1 %v3426_v0  ;;  %2225 = vmatprep.mubr.f32.mxu0 %v3426_v0 }
 0x157   : > { %2964 = vmatmul.mubr.msk.f32.gmra.mrb[4].mxu1 %vm261_vm2, %v2948_v15  ;;  %3100 = vmatmul.mubr.msk.f32.gmra.mrb[20].mxu0 %vm261_vm2, %v3084_v21  ;;  %v4265_v21 = vrot.slane %v2563_v19, %v2567_v17 }
 0x158   : > { %1107 = vmatprep.mubr.f32.mxu1 %v3426_v0  ;;  %2231 = vmatprep.mubr.f32.mxu0 %v3426_v0 }
 0x15b   : > { %2965 = vmatmul.mubr.msk.f32.gmra.mrb[6].mxu1 %vm261_vm2, %v2949_v22  ;;  %3101 = vmatmul.mubr.msk.f32.gmra.mrb[22].mxu0 %vm261_vm2, %v3085_v23  ;;  %v4267_v23 = vrot.slane %v2563_v19, %v2571_v20 }
 0x15c   : > { %1113 = vmatprep.mubr.f32.mxu1 %v3426_v0  ;;  %2237 = vmatprep.mubr.f32.mxu0 %v3426_v0 }
 0x15f   : > { %2966 = vmatmul.mubr.msk.f32.gmra.mrb[8].mxu1 %vm261_vm2, %v2950_v24  ;;  %3102 = vmatmul.mubr.msk.f32.gmra.mrb[24].mxu0 %vm261_vm2, %v3086_v25 }
 0x160   : > { %1119 = vmatprep.mubr.f32.mxu1 %v3426_v0  ;;  %2243 = vmatprep.mubr.f32.mxu0 %v3426_v0 }
 0x163   : > { %2967 = vmatmul.mubr.msk.f32.gmra.mrb[10].mxu1 %vm261_vm2, %v2951_v26  ;;  %3103 = vmatmul.mubr.msk.f32.gmra.mrb[26].mxu0 %vm261_vm2, %v3087_v27 }
 0x164   : > { %1125 = vmatprep.mubr.f32.mxu1 %v3426_v0  ;;  %2249 = vmatprep.mubr.f32.mxu0 %v3426_v0 }
 0x167   : > { %2968 = vmatmul.mubr.msk.f32.gmra.mrb[12].mxu1 %vm261_vm2, %v2952_v28  ;;  %3104 = vmatmul.mubr.msk.f32.gmra.mrb[28].mxu0 %vm261_vm2, %v3088_v29 }
 0x168   : > { %1131 = vmatprep.mubr.f32.mxu1 %v3426_v0  ;;  %2255 = vmatprep.mubr.f32.mxu0 %v3426_v0 }
 0x16b   : > { %2969 = vmatmul.mubr.msk.f32.gmra.mrb[14].mxu1 %vm261_vm2, %v2953_v30  ;;  %3105 = vmatmul.mubr.msk.f32.gmra.mrb[30].mxu0 %vm261_vm2, %v3089_v31 }
 0x16c   : > { %1137 = vmatprep.mubr.f32.mxu1 %v3426_v0  ;;  %2434 = vmatprep.mubr.f32.mxu0 %v3426_v0 }
 0x16f   : > { %2970 = vmatmul.mubr.msk.f32.gmra.mrb[16].mxu1 %vm261_vm2, %v2954_v32  ;;  %3122 = vmatmul.mubr.msk.f32.vlgmr.msra.gmra.mrb[0].mxu0 %vm261_vm2, %v3106_v33 }
 0x170   : > { %1143 = vmatprep.mubr.f32.mxu1 %v3426_v0  ;;  %2440 = vmatprep.mubr.f32.mxu0 %v3426_v0 }
 0x173   : > { %2971 = vmatmul.mubr.msk.f32.gmra.mrb[18].mxu1 %vm261_vm2, %v2955_v34  ;;  %3123 = vmatmul.mubr.msk.f32.gmra.mrb[2].mxu0 %vm261_vm2, %v3107_v35 }
 0x174   : > { %1149 = vmatprep.mubr.f32.mxu1 %v3426_v0  ;;  %2446 = vmatprep.mubr.f32.mxu0 %v3426_v0 }
 0x177   : > { %2972 = vmatmul.mubr.msk.f32.gmra.mrb[20].mxu1 %vm261_vm2, %v2956_v36  ;;  %3124 = vmatmul.mubr.msk.f32.gmra.mrb[4].mxu0 %vm261_vm2, %v3108_v37 }
 0x178   : > { %1155 = vmatprep.mubr.f32.mxu1 %v3426_v0  ;;  %2452 = vmatprep.mubr.f32.mxu0 %v3426_v0 }
 0x17b   : > { %2973 = vmatmul.mubr.msk.f32.gmra.mrb[22].mxu1 %vm261_vm2, %v2957_v38  ;;  %3125 = vmatmul.mubr.msk.f32.gmra.mrb[6].mxu0 %vm261_vm2, %v3109_v39 }
 0x17c   : > { %1161 = vmatprep.mubr.f32.mxu1 %v3426_v0  ;;  %2458 = vmatprep.mubr.f32.mxu0 %v3426_v0 }
 0x17f   : > { %2974 = vmatmul.mubr.msk.f32.gmra.mrb[24].mxu1 %vm261_vm2, %v2958_v40  ;;  %3126 = vmatmul.mubr.msk.f32.gmra.mrb[8].mxu0 %vm261_vm2, %v3110_v41 }
 0x180   : > { %1167 = vmatprep.mubr.f32.mxu1 %v3426_v0  ;;  %2464 = vmatprep.mubr.f32.mxu0 %v3426_v0 }
 0x183   : > { %2975 = vmatmul.mubr.msk.f32.gmra.mrb[26].mxu1 %vm261_vm2, %v2959_v42  ;;  %3127 = vmatmul.mubr.msk.f32.gmra.mrb[10].mxu0 %vm261_vm2, %v3111_v43 }
 0x184   : > { %1173 = vmatprep.mubr.f32.mxu1 %v3426_v0  ;;  %2470 = vmatprep.mubr.f32.mxu0 %v3426_v0 }
 0x187   : > { %2976 = vmatmul.mubr.msk.f32.gmra.mrb[28].mxu1 %vm261_vm2, %v2960_v44  ;;  %3128 = vmatmul.mubr.msk.f32.gmra.mrb[12].mxu0 %vm261_vm2, %v3112_v45 }
 0x188   : > { %1179 = vmatprep.mubr.f32.mxu1 %v3426_v0  ;;  %2476 = vmatprep.mubr.f32.mxu0 %v3426_v0 }
 0x18b   : > { %2977 = vmatmul.mubr.msk.f32.gmra.mrb[30].mxu1 %vm261_vm2, %v2961_v46  ;;  %3129 = vmatmul.mubr.msk.f32.gmra.mrb[14].mxu0 %vm261_vm2, %v3113_v47 }
 0x18c   : > { %1406 = vmatprep.mubr.f32.mxu1 %v3426_v0  ;;  %2482 = vmatprep.mubr.f32.mxu0 %v3426_v0 }
 0x18f   : > { %3002 = vmatmul.mubr.msk.f32.vlgmr.msra.gmra.mrb[16].mxu1 %vm261_vm2, %v2986_v48  ;;  %3130 = vmatmul.mubr.msk.f32.gmra.mrb[16].mxu0 %vm261_vm2, %v3114_v49 }
 0x190   : > { %1412 = vmatprep.mubr.f32.mxu1 %v3426_v0  ;;  %2488 = vmatprep.mubr.f32.mxu0 %v3426_v0 }
 0x193   : > { %3003 = vmatmul.mubr.msk.f32.gmra.mrb[18].mxu1 %vm261_vm2, %v2987_v50  ;;  %3131 = vmatmul.mubr.msk.f32.gmra.mrb[18].mxu0 %vm261_vm2, %v3115_v9 }
 0x194   : > { %1418 = vmatprep.mubr.f32.mxu1 %v3426_v0  ;;  %2494 = vmatprep.mubr.f32.mxu0 %v3426_v0 }
 0x197   : > { %3004 = vmatmul.mubr.msk.f32.gmra.mrb[20].mxu1 %vm261_vm2, %v2988_v51  ;;  %3132 = vmatmul.mubr.msk.f32.gmra.mrb[20].mxu0 %vm261_vm2, %v3116_v52 }
 0x198   : > { %1424 = vmatprep.mubr.f32.mxu1 %v3426_v0  ;;  %2500 = vmatprep.mubr.f32.mxu0 %v3426_v0 }
 0x19b   : > { %3005 = vmatmul.mubr.msk.f32.gmra.mrb[22].mxu1 %vm261_vm2, %v2989_v53  ;;  %3133 = vmatmul.mubr.msk.f32.gmra.mrb[22].mxu0 %vm261_vm2, %v3117_v54 }
 0x19c   : > { %1430 = vmatprep.mubr.f32.mxu1 %v3426_v0  ;;  %2506 = vmatprep.mubr.f32.mxu0 %v3426_v0 }
 0x19f   : > { %3006 = vmatmul.mubr.msk.f32.gmra.mrb[24].mxu1 %vm261_vm2, %v2990_v55  ;;  %3134 = vmatmul.mubr.msk.f32.gmra.mrb[24].mxu0 %vm261_vm2, %v3118_v56 }
 0x1a0   : > { %1436 = vmatprep.mubr.f32.mxu1 %v3426_v0  ;;  %2512 = vmatprep.mubr.f32.mxu0 %v3426_v0 }
 0x1a3   : > { %3007 = vmatmul.mubr.msk.f32.gmra.mrb[26].mxu1 %vm261_vm2, %v2991_v57  ;;  %3135 = vmatmul.mubr.msk.f32.gmra.mrb[26].mxu0 %vm261_vm2, %v3119_v58 }
 0x1a4   : > { %1442 = vmatprep.mubr.f32.mxu1 %v3426_v0  ;;  %2518 = vmatprep.mubr.f32.mxu0 %v3426_v0 }
 0x1a7   : > { %3008 = vmatmul.mubr.msk.f32.gmra.mrb[28].mxu1 %vm261_vm2, %v2992_v59  ;;  %3136 = vmatmul.mubr.msk.f32.gmra.mrb[28].mxu0 %vm261_vm2, %v3120_v60 }
 0x1a8   : > { %1448 = vmatprep.mubr.f32.mxu1 %v3426_v0  ;;  %2524 = vmatprep.mubr.f32.mxu0 %v3426_v0 }
 0x1ab   : > { %3009 = vmatmul.mubr.msk.f32.gmra.mrb[30].mxu1 %vm261_vm2, %v2993_v61  ;;  %3137 = vmatmul.mubr.msk.f32.gmra.mrb[30].mxu0 %vm261_vm2, %v3121_v62 }
 0x222   : > { %v1091_v63 = vpop.f32.mrb[0].mxu1 }
 0x223   : > { %v1093_v1 = vpop.f32.mrb[1].mxu1 }
 0x226   : > { %v1097_v2 = vpop.f32.mrb[2].mxu1 }
 0x227   : > { %v1099_v3 = vpop.f32.mrb[3].mxu1 }
 0x22a   : > { %v1103_v4 = vpop.f32.mrb[4].mxu1 }
 0x22b   : > { %v1105_v5 = vpop.f32.mrb[5].mxu1 }
 0x22e   : > { %v1109_v6 = vpop.f32.mrb[6].mxu1 }
 0x22f   : > { %v1111_v0 = vpop.f32.mrb[7].mxu1 }
 0x232   : > { %v1115_v7 = vpop.f32.mrb[8].mxu1 }
 0x233   : > { %v1117_v8 = vpop.f32.mrb[9].mxu1 }
 0x236   : > { %v4250_v11 = vpop.f32.mrb[10].mxu1 }
 0x237   : > { %v4252_v12 = vpop.f32.mrb[11].mxu1 }
 0x23a   : > { %v4254_v14 = vpop.f32.mrb[12].mxu1 }
 0x23b   : > { %v4256_v16 = vpop.f32.mrb[13].mxu1 }
 0x23e   : > { %v4258_v18 = vpop.f32.mrb[14].mxu1 }
 0x23f   : > { %v4263_v15 = vpop.f32.mrb[15].mxu1 }
 0x242   : > { %v2436_v22 = vpop.f32.mrb[0].mxu0 }
 0x243   : > { %v3144_v24 = vadd.f32 %v2436_v22, %v1091_v63  ;;  %v2438_v25 = vpop.f32.mrb[1].mxu0 }
 0x244   : > { %v3145_v26 = vadd.f32 %v2438_v25, %v1093_v1 }
 0x245   : > { %v2575_v27 = vmul.f32 %v3144_v24, %v4265_v21 }
 0x246   : > { %v2576_v28 = vmul.f32 %v3145_v26, %v4267_v23  ;;  %v2442_v29 = vpop.f32.mrb[2].mxu0 }
 0x247   : > { %v3146_v30 = vadd.f32 %v2442_v29, %v1097_v2  ;;  %v2444_v31 = vpop.f32.mrb[3].mxu0  ;;  %v2672_v32 = vmul.f32 %v2575_v27, %v2575_v27 }
 0x248   : > { %v3147_v33 = vadd.f32 %v2444_v31, %v1099_v3  ;;  %v2607_v34 = vadd.f32 %v2576_v28, %v2575_v27  ;;  %v2673_v35 = vmul.f32 %v2576_v28, %v2576_v28 }
 0x249   : > { %v2577_v36 = vmul.f32 %v3146_v30, %v4265_v21 }
 0x24a   : > { %v2578_v37 = vmul.f32 %v3147_v33, %v4267_v23  ;;  %2608 = vadd.xlane.f32.xlu0 %v2607_v34  ;;  %v2448_v38 = vpop.f32.mrb[4].mxu0  ;;  %v2704_v39 = vadd.f32 %v2673_v35, %v2672_v32 }
 0x24b   : > { %v3148_v40 = vadd.f32 %v2448_v38, %v1103_v4  ;;  %v2450_v41 = vpop.f32.mrb[5].mxu0  ;;  %v2674_v42 = vmul.f32 %v2577_v36, %v2577_v36 }
 0x24c   : > { %v3149_v43 = vadd.f32 %v2450_v41, %v1105_v5  ;;  %2705 = vadd.xlane.f32.xlu1 %v2704_v39  ;;  %v2675_v44 = vmul.f32 %v2578_v37, %v2578_v37  ;;  %v2610_v45 = vadd.f32 %v2578_v37, %v2577_v36 }
 0x24d   : > { %v2579_v46 = vmul.f32 %v3148_v40, %v4265_v21 }
 0x24e   : > { %v2580_v47 = vmul.f32 %v3149_v43, %v4267_v23  ;;  %v2454_v48 = vpop.f32.mrb[6].mxu0  ;;  %v2707_v49 = vadd.f32 %v2675_v44, %v2674_v42 }
 0x24f   : > { %v3150_v50 = vadd.f32 %v2454_v48, %v1109_v6  ;;  %v2456_v9 = vpop.f32.mrb[7].mxu0  ;;  %v2676_v51 = vmul.f32 %v2579_v46, %v2579_v46 }
 0x250   : > { %v3151_v52 = vadd.f32 %v2456_v9, %v1111_v0  ;;  %2708 = vadd.xlane.f32.xlu0 %v2707_v49  ;;  %2611 = vadd.xlane.f32.xlu1 %v2610_v45  ;;  %v2677_v53 = vmul.f32 %v2580_v47, %v2580_v47  ;;  %v2613_v54 = vadd.f32 %v2580_v47, %v2579_v46 }
 0x251   : > { %v2581_v55 = vmul.f32 %v3150_v50, %v4265_v21 }
 0x252   : > { %v2582_v56 = vmul.f32 %v3151_v52, %v4267_v23  ;;  %v2460_v57 = vpop.f32.mrb[8].mxu0  ;;  %v2710_v58 = vadd.f32 %v2677_v53, %v2676_v51 }
 0x253   : > { %v3152_v59 = vadd.f32 %v2460_v57, %v1115_v7  ;;  %v2462_v60 = vpop.f32.mrb[9].mxu0  ;;  %v2678_v61 = vmul.f32 %v2581_v55, %v2581_v55 }
 0x254   : > { %v3153_v62 = vadd.f32 %v2462_v60, %v1117_v8  ;;  %2711 = vadd.xlane.f32.xlu1 %v2710_v58  ;;  %2614 = vadd.xlane.f32.xlu0 %v2613_v54  ;;  %v2616_v63 = vadd.f32 %v2582_v56, %v2581_v55  ;;  %v2679_v1 = vmul.f32 %v2582_v56, %v2582_v56 }
 0x255   : > { %v2583_v2 = vmul.f32 %v3152_v59, %v4265_v21 }
 0x256   : > { %v2584_v3 = vmul.f32 %v3153_v62, %v4267_v23  ;;  %v2466_v4 = vpop.f32.mrb[10].mxu0  ;;  %v2713_v5 = vadd.f32 %v2679_v1, %v2678_v61 }
 0x257   : > { %v3154_v6 = vadd.f32 %v2466_v4, %v4250_v11  ;;  %v2468_v0 = vpop.f32.mrb[11].mxu0  ;;  %v2680_v10 = vmul.f32 %v2583_v2, %v2583_v2 }
 0x258   : > { %v3155_v13 = vadd.f32 %v2468_v0, %v4252_v12  ;;  %2617 = vadd.xlane.f32.xlu0 %v2616_v63  ;;  %v2619_v7 = vadd.f32 %v2584_v3, %v2583_v2  ;;  %v2681_v17 = vmul.f32 %v2584_v3, %v2584_v3 }
 0x259   : > { %v2585_v8 = vmul.f32 %v3154_v6, %v4265_v21 }
 0x25a   : > { %v2586_v19 = vmul.f32 %v3155_v13, %v4267_v23  ;;  %2620 = vadd.xlane.f32.xlu1 %v2619_v7  ;;  %v2472_v20 = vpop.f32.mrb[12].mxu0  ;;  %v2716_v22 = vadd.f32 %v2681_v17, %v2680_v10 }
 0x25b   : > { %v3156_v24 = vadd.f32 %v2472_v20, %v4254_v14  ;;  %v2474_v25 = vpop.f32.mrb[13].mxu0  ;;  %v2682_v26 = vmul.f32 %v2585_v8, %v2585_v8 }
 0x25c   : > { %v3157_v11 = vadd.f32 %v2474_v25, %v4256_v16  ;;  %2714 = vadd.xlane.f32.xlu0 %v2713_v5  ;;  %v2622_v27 = vadd.f32 %v2586_v19, %v2585_v8  ;;  %v2683_v28 = vmul.f32 %v2586_v19, %v2586_v19 }
 0x25d   : > { %v2587_v12 = vmul.f32 %v3156_v24, %v4265_v21 }
 0x25e   : > { %v2588_v29 = vmul.f32 %v3157_v11, %v4267_v23  ;;  %2717 = vadd.xlane.f32.xlu1 %v2716_v22  ;;  %v2478_v30 = vpop.f32.mrb[14].mxu0  ;;  %v2719_v31 = vadd.f32 %v2683_v28, %v2682_v26 }
 0x25f   : > { %v3158_v32 = vadd.f32 %v2478_v30, %v4258_v18  ;;  %v2480_v33 = vpop.f32.mrb[15].mxu0  ;;  %v2684_v34 = vmul.f32 %v2587_v12, %v2587_v12 }
 0x260   : > { %v3159_v14 = vadd.f32 %v2480_v33, %v4263_v15  ;;  %2623 = vadd.xlane.f32.xlu0 %v2622_v27  ;;  %v2625_v35 = vadd.f32 %v2588_v29, %v2587_v12  ;;  %v2685_v36 = vmul.f32 %v2588_v29, %v2588_v29 }
 0x261   : > { %v2589_v16 = vmul.f32 %v3158_v32, %v4265_v21 }
 0x262   : > { %v2590_v37 = vmul.f32 %v3159_v14, %v4267_v23  ;;  %v1408_v38 = vpop.f32.mrb[16].mxu1  ;;  %2626 = vadd.xlane.f32.xlu1 %v2625_v35  ;;  %v2484_v39 = vpop.f32.mrb[16].mxu0  ;;  %v2722_v40 = vadd.f32 %v2685_v36, %v2684_v34 }
 0x263   : > { %v3160_v41 = vadd.f32 %v2484_v39, %v1408_v38  ;;  %v1410_v42 = vpop.f32.mrb[17].mxu1  ;;  %v2486_v43 = vpop.f32.mrb[17].mxu0  ;;  %v2686_v44 = vmul.f32 %v2589_v16, %v2589_v16 }
 0x264   : > { %v3161_v18 = vadd.f32 %v2486_v43, %v1410_v42  ;;  %2720 = vadd.xlane.f32.xlu0 %v2719_v31  ;;  %v2628_v45 = vadd.f32 %v2590_v37, %v2589_v16  ;;  %v2687_v46 = vmul.f32 %v2590_v37, %v2590_v37 }
 0x265   : > { %v2591_v15 = vmul.f32 %v3160_v41, %v4265_v21 }
 0x266   : > { %v2592_v47 = vmul.f32 %v3161_v18, %v4267_v23  ;;  %v1414_v48 = vpop.f32.mrb[18].mxu1  ;;  %2723 = vadd.xlane.f32.xlu1 %v2722_v40  ;;  %v2490_v49 = vpop.f32.mrb[18].mxu0  ;;  %v2725_v50 = vadd.f32 %v2687_v46, %v2686_v44 }
 0x267   : > { %v3162_v9 = vadd.f32 %v2490_v49, %v1414_v48  ;;  %v1416_v51 = vpop.f32.mrb[19].mxu1  ;;  %v2492_v52 = vpop.f32.mrb[19].mxu0  ;;  %v2688_v53 = vmul.f32 %v2591_v15, %v2591_v15 }
 0x268   : > { %v3163_v54 = vadd.f32 %v2492_v52, %v1416_v51  ;;  %2629 = vadd.xlane.f32.xlu0 %v2628_v45  ;;  %v2631_v55 = vadd.f32 %v2592_v47, %v2591_v15  ;;  %v2689_v56 = vmul.f32 %v2592_v47, %v2592_v47 }
 0x269   : > { %v2593_v57 = vmul.f32 %v3162_v9, %v4265_v21 }
 0x26a   : > { %v2594_v58 = vmul.f32 %v3163_v54, %v4267_v23  ;;  %v1420_v59 = vpop.f32.mrb[20].mxu1  ;;  %2632 = vadd.xlane.f32.xlu1 %v2631_v55  ;;  %v2496_v60 = vpop.f32.mrb[20].mxu0  ;;  %v2728_v61 = vadd.f32 %v2689_v56, %v2688_v53 }
 0x26b   : > { %v3164_v62 = vadd.f32 %v2496_v60, %v1420_v59  ;;  %v1422_v63 = vpop.f32.mrb[21].mxu1  ;;  %v2498_v1 = vpop.f32.mrb[21].mxu0  ;;  %v2690_v2 = vmul.f32 %v2593_v57, %v2593_v57 }
 0x26c   : > { %v3165_v3 = vadd.f32 %v2498_v1, %v1422_v63  ;;  %2726 = vadd.xlane.f32.xlu0 %v2725_v50  ;;  %v2634_v4 = vadd.f32 %v2594_v58, %v2593_v57  ;;  %v2691_v5 = vmul.f32 %v2594_v58, %v2594_v58 }
 0x26d   : > { %v2595_v6 = vmul.f32 %v3164_v62, %v4265_v21 }
 0x26e   : > { %v2596_v0 = vmul.f32 %v3165_v3, %v4267_v23  ;;  %v1426_v10 = vpop.f32.mrb[22].mxu1  ;;  %2729 = vadd.xlane.f32.xlu1 %v2728_v61  ;;  %v2502_v13 = vpop.f32.mrb[22].mxu0  ;;  %v2731_v7 = vadd.f32 %v2691_v5, %v2690_v2 }
 0x26f   : > { %v3166_v17 = vadd.f32 %v2502_v13, %v1426_v10  ;;  %v1428_v8 = vpop.f32.mrb[23].mxu1  ;;  %v2504_v19 = vpop.f32.mrb[23].mxu0  ;;  %v2692_v20 = vmul.f32 %v2595_v6, %v2595_v6 }
 0x270   : > { %v3167_v22 = vadd.f32 %v2504_v19, %v1428_v8  ;;  %2635 = vadd.xlane.f32.xlu0 %v2634_v4  ;;  %v2637_v24 = vadd.f32 %v2596_v0, %v2595_v6  ;;  %v2693_v25 = vmul.f32 %v2596_v0, %v2596_v0 }
 0x271   : > { %v2597_v26 = vmul.f32 %v3166_v17, %v4265_v21 }
 0x272   : > { %v2598_v11 = vmul.f32 %v3167_v22, %v4267_v23  ;;  %v1432_v27 = vpop.f32.mrb[24].mxu1  ;;  %2638 = vadd.xlane.f32.xlu1 %v2637_v24  ;;  %v2508_v28 = vpop.f32.mrb[24].mxu0  ;;  %v2734_v12 = vadd.f32 %v2693_v25, %v2692_v20 }
 0x273   : > { %v3168_v29 = vadd.f32 %v2508_v28, %v1432_v27  ;;  %v1434_v30 = vpop.f32.mrb[25].mxu1  ;;  %v2510_v31 = vpop.f32.mrb[25].mxu0  ;;  %v2694_v32 = vmul.f32 %v2597_v26, %v2597_v26 }
 0x274   : > { %v3169_v33 = vadd.f32 %v2510_v31, %v1434_v30  ;;  %2732 = vadd.xlane.f32.xlu0 %v2731_v7  ;;  %v2640_v34 = vadd.f32 %v2598_v11, %v2597_v26  ;;  %v2695_v14 = vmul.f32 %v2598_v11, %v2598_v11 }
 0x275   : > { %v2599_v35 = vmul.f32 %v3168_v29, %v4265_v21 }
 0x276   : > { %v2600_v36 = vmul.f32 %v3169_v33, %v4267_v23  ;;  %v1438_v16 = vpop.f32.mrb[26].mxu1  ;;  %2735 = vadd.xlane.f32.xlu1 %v2734_v12  ;;  %v2514_v37 = vpop.f32.mrb[26].mxu0  ;;  %v2737_v38 = vadd.f32 %v2695_v14, %v2694_v32 }
 0x277   : > { %v3170_v39 = vadd.f32 %v2514_v37, %v1438_v16  ;;  %v1440_v40 = vpop.f32.mrb[27].mxu1  ;;  %v2516_v41 = vpop.f32.mrb[27].mxu0  ;;  %v2696_v42 = vmul.f32 %v2599_v35, %v2599_v35 }
 0x278   : > { %v3171_v43 = vadd.f32 %v2516_v41, %v1440_v40  ;;  %2641 = vadd.xlane.f32.xlu0 %v2640_v34  ;;  %v2643_v44 = vadd.f32 %v2600_v36, %v2599_v35  ;;  %v2697_v18 = vmul.f32 %v2600_v36, %v2600_v36 }
 0x279   : > { %v2601_v45 = vmul.f32 %v3170_v39, %v4265_v21 }
 0x27a   : > { %v2602_v46 = vmul.f32 %v3171_v43, %v4267_v23  ;;  %v1444_v15 = vpop.f32.mrb[28].mxu1  ;;  %2644 = vadd.xlane.f32.xlu1 %v2643_v44  ;;  %v2520_v47 = vpop.f32.mrb[28].mxu0  ;;  %v2740_v48 = vadd.f32 %v2697_v18, %v2696_v42 }
 0x27b   : > { %v3172_v49 = vadd.f32 %v2520_v47, %v1444_v15  ;;  %v1446_v50 = vpop.f32.mrb[29].mxu1  ;;  %v2522_v9 = vpop.f32.mrb[29].mxu0  ;;  %v2698_v51 = vmul.f32 %v2601_v45, %v2601_v45 }
 0x27c   : > { %v3173_v52 = vadd.f32 %v2522_v9, %v1446_v50  ;;  %2738 = vadd.xlane.f32.xlu0 %v2737_v38  ;;  %v2646_v53 = vadd.f32 %v2602_v46, %v2601_v45  ;;  %v2699_v54 = vmul.f32 %v2602_v46, %v2602_v46 }
 0x27d   : > { %v2603_v55 = vmul.f32 %v3172_v49, %v4265_v21 }
 0x27e   : > { %v2604_v56 = vmul.f32 %v3173_v52, %v4267_v23  ;;  %v1450_v57 = vpop.f32.mrb[30].mxu1  ;;  %2741 = vadd.xlane.f32.xlu1 %v2740_v48  ;;  %v2526_v58 = vpop.f32.mrb[30].mxu0  ;;  %v2743_v59 = vadd.f32 %v2699_v54, %v2698_v51 }
 0x27f   : > { %v3174_v60 = vadd.f32 %v2526_v58, %v1450_v57  ;;  %v1452_v61 = vpop.f32.mrb[31].mxu1  ;;  %v2528_v62 = vpop.f32.mrb[31].mxu0  ;;  %v2700_v63 = vmul.f32 %v2603_v55, %v2603_v55 }
 0x280   : > { %v3175_v1 = vadd.f32 %v2528_v62, %v1452_v61  ;;  %2647 = vadd.xlane.f32.xlu0 %v2646_v53  ;;  %v2649_v2 = vadd.f32 %v2604_v56, %v2603_v55  ;;  %v2701_v3 = vmul.f32 %v2604_v56, %v2604_v56 }
 0x281   : > { %v2605_v4 = vmul.f32 %v3174_v60, %v4265_v21 }
 0x282   : > { %v2606_v5 = vmul.f32 %v3175_v1, %v4267_v23  ;;  %2650 = vadd.xlane.f32.xlu1 %v2649_v2  ;;  %v2746_v6 = vadd.f32 %v2701_v3, %v2700_v63 }
 0x283   : > { %v2702_v0 = vmul.f32 %v2605_v4, %v2605_v4 }
 0x284   : > { %2744 = vadd.xlane.f32.xlu0 %v2743_v59  ;;  %v2652_v10 = vadd.f32 %v2606_v5, %v2605_v4  ;;  %v2703_v13 = vmul.f32 %v2606_v5, %v2606_v5 }
 0x286   : > { %2747 = vadd.xlane.f32.xlu1 %v2746_v6  ;;  %v2749_v7 = vadd.f32 %v2703_v13, %v2702_v0 }
 0x288   : > { %2653 = vadd.xlane.f32.xlu0 %v2652_v10 }
 0x28c   : > { %2750 = vadd.xlane.f32.xlu0 %v2749_v7 }
 0x2d7   : > { %v2609_v21 = vpop.xlane.xlu0 %2608 }
 0x2d8   : > { %2656 = vst.msk [vmem:[%s4311_s8] sm:$0xff] %vm2655_vm9, %v2609_v21 }
 0x2d9   : > { %v2706_v23 = vpop.xlane.xlu1 %2705 }
 0x2da   : > { %2752 = vst.msk [vmem:[%s4316_s11] sm:$0xff] %vm2655_vm9, %v2706_v23 }
 0x2dd   : > { %v2709_v17 = vpop.xlane.xlu0 %2708  ;;  %v2612_v8 = vpop.xlane.xlu1 %2611 }
 0x2de   : > { %2753 = vst.msk [vmem:[%s4316_s11 + $0x8] sm:$0xff] %vm2655_vm9, %v2709_v17  ;;  %2657 = vst.msk [vmem:[%s4311_s8 + $0x8] sm:$0xff] %vm2655_vm9, %v2612_v8 }
 0x2e1   : > { %v2712_v19 = vpop.xlane.xlu1 %2711  ;;  %v2615_v20 = vpop.xlane.xlu0 %2614 }
 0x2e2   : > { %2754 = vst.msk [vmem:[%s4316_s11 + $0x10] sm:$0xff] %vm2655_vm9, %v2712_v19  ;;  %2658 = vst.msk [vmem:[%s4311_s8 + $0x10] sm:$0xff] %vm2655_vm9, %v2615_v20 }
 0x2e5   : > { %v2618_v22 = vpop.xlane.xlu0 %2617 }
 0x2e6   : > { %2659 = vst.msk [vmem:[%s4311_s8 + $0x18] sm:$0xff] %vm2655_vm9, %v2618_v22 }
 0x2e7   : > { %v2621_v24 = vpop.xlane.xlu1 %2620 }
 0x2e8   : > { %2660 = vst.msk [vmem:[%s4311_s8 + $0x20] sm:$0xff] %vm2655_vm9, %v2621_v24 }
 0x2e9   : > { %v2715_v25 = vpop.xlane.xlu0 %2714 }
 0x2ea   : > { %2755 = vst.msk [vmem:[%s4316_s11 + $0x18] sm:$0xff] %vm2655_vm9, %v2715_v25 }
 0x2eb   : > { %v2718_v26 = vpop.xlane.xlu1 %2717 }
 0x2ec   : > { %2756 = vst.msk [vmem:[%s4316_s11 + $0x20] sm:$0xff] %vm2655_vm9, %v2718_v26 }
 0x2ed   : > { %v2624_v11 = vpop.xlane.xlu0 %2623 }
 0x2ee   : > { %2661 = vst.msk [vmem:[%s4311_s8 + $0x28] sm:$0xff] %vm2655_vm9, %v2624_v11 }
 0x2ef   : > { %v2627_v27 = vpop.xlane.xlu1 %2626 }
 0x2f0   : > { %2662 = vst.msk [vmem:[%s4311_s8 + $0x30] sm:$0xff] %vm2655_vm9, %v2627_v27 }
 0x2f1   : > { %v2721_v28 = vpop.xlane.xlu0 %2720 }
 0x2f2   : > { %2757 = vst.msk [vmem:[%s4316_s11 + $0x28] sm:$0xff] %vm2655_vm9, %v2721_v28 }
 0x2f3   : > { %v2724_v12 = vpop.xlane.xlu1 %2723 }
 0x2f4   : > { %2758 = vst.msk [vmem:[%s4316_s11 + $0x30] sm:$0xff] %vm2655_vm9, %v2724_v12 }
 0x2f5   : > { %v2630_v29 = vpop.xlane.xlu0 %2629 }
 0x2f6   : > { %2663 = vst.msk [vmem:[%s4311_s8 + $0x38] sm:$0xff] %vm2655_vm9, %v2630_v29 }
 0x2f7   : > { %v2633_v30 = vpop.xlane.xlu1 %2632 }
 0x2f8   : > { %2664 = vst.msk [vmem:[%s4311_s8 + $0x40] sm:$0xff] %vm2655_vm9, %v2633_v30 }
 0x2f9   : > { %v2727_v31 = vpop.xlane.xlu0 %2726 }
 0x2fa   : > { %2759 = vst.msk [vmem:[%s4316_s11 + $0x38] sm:$0xff] %vm2655_vm9, %v2727_v31 }
 0x2fb   : > { %v2730_v32 = vpop.xlane.xlu1 %2729 }
 0x2fc   : > { %2760 = vst.msk [vmem:[%s4316_s11 + $0x40] sm:$0xff] %vm2655_vm9, %v2730_v32 }
 0x2fd   : > { %v2636_v33 = vpop.xlane.xlu0 %2635 }
 0x2fe   : > { %2665 = vst.msk [vmem:[%s4311_s8 + $0x48] sm:$0xff] %vm2655_vm9, %v2636_v33 }
 0x2ff   : > { %v2639_v34 = vpop.xlane.xlu1 %2638 }
 0x300   : > { %2666 = vst.msk [vmem:[%s4311_s8 + $0x50] sm:$0xff] %vm2655_vm9, %v2639_v34 }
 0x301   : > { %v2733_v14 = vpop.xlane.xlu0 %2732 }
 0x302   : > { %2761 = vst.msk [vmem:[%s4316_s11 + $0x48] sm:$0xff] %vm2655_vm9, %v2733_v14 }
 0x303   : > { %v2736_v35 = vpop.xlane.xlu1 %2735 }
 0x304   : > { %2762 = vst.msk [vmem:[%s4316_s11 + $0x50] sm:$0xff] %vm2655_vm9, %v2736_v35 }
 0x305   : > { %v2642_v36 = vpop.xlane.xlu0 %2641 }
 0x306   : > { %2667 = vst.msk [vmem:[%s4311_s8 + $0x58] sm:$0xff] %vm2655_vm9, %v2642_v36 }
 0x307   : > { %v2645_v16 = vpop.xlane.xlu1 %2644 }
 0x308   : > { %2668 = vst.msk [vmem:[%s4311_s8 + $0x60] sm:$0xff] %vm2655_vm9, %v2645_v16 }
 0x309   : > { %v2739_v37 = vpop.xlane.xlu0 %2738 }
 0x30a   : > { %2763 = vst.msk [vmem:[%s4316_s11 + $0x58] sm:$0xff] %vm2655_vm9, %v2739_v37 }
 0x30b   : > { %v2742_v38 = vpop.xlane.xlu1 %2741 }
 0x30c   : > { %2764 = vst.msk [vmem:[%s4316_s11 + $0x60] sm:$0xff] %vm2655_vm9, %v2742_v38 }
 0x30d   : > { %v2648_v39 = vpop.xlane.xlu0 %2647 }
 0x30e   : > { %2669 = vst.msk [vmem:[%s4311_s8 + $0x68] sm:$0xff] %vm2655_vm9, %v2648_v39 }
 0x30f   : > { %v2651_v40 = vpop.xlane.xlu1 %2650 }
 0x310   : > { %2670 = vst.msk [vmem:[%s4311_s8 + $0x70] sm:$0xff] %vm2655_vm9, %v2651_v40 }
 0x311   : > { %v2745_v41 = vpop.xlane.xlu0 %2744 }
 0x312   : > { %2765 = vst.msk [vmem:[%s4316_s11 + $0x68] sm:$0xff] %vm2655_vm9, %v2745_v41 }
 0x313   : > { %v2748_v42 = vpop.xlane.xlu1 %2747 }
 0x314   : > { %2766 = vst.msk [vmem:[%s4316_s11 + $0x70] sm:$0xff] %vm2655_vm9, %v2748_v42 }
 0x315   : > { %v2654_v43 = vpop.xlane.xlu0 %2653 }
 0x316   : > { %2671 = vst.msk [vmem:[%s4311_s8 + $0x78] sm:$0xff] %vm2655_vm9, %v2654_v43 }
 0x319   : > { %v2751_v44 = vpop.xlane.xlu0 %2750 }
 0x31a   : > { %2767 = vst.msk [vmem:[%s4316_s11 + $0x78] sm:$0xff] %vm2655_vm9, %v2751_v44 }
 0x31b PF: > { %s15_s15 = sadd.s32 1, %s3424_s15  }
 0x31c   : > { %p12_p4 = scmp.ge.s32.totalorder %s15_s15, 4  }
 0x31e   :  { %14 = sbr.rel (!%p12_p4) target bundleno = 1 (0x1), region = 82 }

</bundles_post_ra>
